<compile_context>
chip_gen: v7x
topology: tpu7x:2x2x1
jax: 0.10.0
libtpu: 0.0.40
codegen_flags: <defaults>
</compile_context>

<pallas_src>
import functools
import math

import jax
import jax.numpy as jnp
import numpy as np
from jax.experimental import pallas as pl
from jax.experimental.pallas import tpu as pltpu


# ----------------------------------------------------------------------------
# Kernel: grid = (batch, depth).  One step = one decoder layer for one batch
# element; x lives in a VMEM scratch across the depth axis.
# ----------------------------------------------------------------------------
def decoder_kernel(
    x_ref, m_ref,                        # (1, N, D), (1, Nm, D)
    g1_ref, be1_ref,                     # (1, 1, D) pre-norm (shared x & m)
    wq_ref, wk_ref, wv_ref,              # (1, D, inner) bf16
    wo_ref,                              # (1, heads, dim_head, D) bf16
    bo_ref,                              # (1, 1, D)
    g2_ref, be2_ref,                     # (1, 1, D) pre-norm for FF
    w1_ref, b1_ref,                      # (1, D, mlp) bf16, (1, 1, mlp)
    w2_ref, b2_ref,                      # (1, mlp, D) bf16, (1, 1, D)
    o_ref,                               # (1, N, D)
    x_scr,                               # VMEM (N, D) f32 running activation
    *, heads, dim_head, scale,
):
    layer = pl.program_id(1)             # depth axis (sequential)

    @pl.when(layer == 0)
    def _():                             # load fresh activations for this b
        x_scr[...] = x_ref[0].astype(jnp.float32)

    x = x_scr[...]                       # (N, D) f32
    m = m_ref[0].astype(jnp.float32)     # (Nm, D) f32

    def layernorm(t, g, b):
        mu = jnp.mean(t, axis=-1, keepdims=True)
        var = jnp.mean((t - mu) * (t - mu), axis=-1, keepdims=True)
        return (t - mu) * jax.lax.rsqrt(var + 1e-5) * g + b

    # ---- PreNorm2: same LayerNorm applied to x (query) and m (memory) ----
    g1 = g1_ref[0]
    be1 = be1_ref[0]
    xn = layernorm(x, g1, be1).astype(jnp.bfloat16)
    mn = layernorm(m, g1, be1).astype(jnp.bfloat16)

    # ---- Cross attention: q/k/v projections (bf16 operands, f32 acc) ----
    q = jnp.dot(xn, wq_ref[0], preferred_element_type=jnp.float32) * scale
    k = jnp.dot(mn, wk_ref[0], preferred_element_type=jnp.float32)
    v = jnp.dot(mn, wv_ref[0], preferred_element_type=jnp.float32)
    q = q.astype(jnp.bfloat16)           # (N, inner), scale already folded in
    k = k.astype(jnp.bfloat16)           # (Nm, inner)
    v = v.astype(jnp.bfloat16)           # (Nm, inner)

    # Per-head attention; each head's output is folded directly into its slice
    # of the output projection and summed -> no lane-axis concatenate.
    acc = None
    for h in range(heads):
        lo = h * dim_head
        qh = q[:, lo:lo + dim_head]      # (N, d)
        kh = k[:, lo:lo + dim_head]      # (Nm, d)
        vh = v[:, lo:lo + dim_head]      # (Nm, d)
        dots = jax.lax.dot_general(       # q @ k^T, no explicit transpose
            qh, kh, (((1,), (1,)), ((), ())),
            preferred_element_type=jnp.float32)                  # (N, Nm)
        dots = dots - jnp.max(dots, axis=-1, keepdims=True)
        p = jnp.exp(dots)
        attn = p * pl.reciprocal(jnp.sum(p, axis=-1, keepdims=True),
                                 approx=True)
        oh = jnp.dot(attn.astype(jnp.bfloat16), vh,
                     preferred_element_type=jnp.float32)          # (N, d)
        contrib = jnp.dot(oh.astype(jnp.bfloat16), wo_ref[0, h],
                          preferred_element_type=jnp.float32)     # (N, D)
        acc = contrib if acc is None else acc + contrib

    x = x + acc + bo_ref[0]              # Residual2 (+ output-proj bias)

    # ---- PreNorm + FeedForward (exact erf GELU, matching nn.GELU default) ----
    xn2 = layernorm(x, g2_ref[0], be2_ref[0]).astype(jnp.bfloat16)
    h1 = jnp.dot(xn2, w1_ref[0], preferred_element_type=jnp.float32) + b1_ref[0]
    h1 = 0.5 * h1 * (1.0 + jax.lax.erf(h1 * (1.0 / math.sqrt(2.0))))
    ff = jnp.dot(h1.astype(jnp.bfloat16), w2_ref[0],
                 preferred_element_type=jnp.float32) + b2_ref[0]
    x = x + ff                           # Residual

    x_scr[...] = x                       # carry to next layer
    o_ref[0] = x.astype(o_ref.dtype)     # last layer's write is what flushes


# ----------------------------------------------------------------------------
# Wrapper: one pallas_call for the whole decoder (all layers fused).
# ----------------------------------------------------------------------------
def transformer_decoder(x, m, layer_params, *, heads, dim_head):
    B, N, D = x.shape
    _, Nm, _ = m.shape
    depth = len(layer_params)
    inner = heads * dim_head
    mlp = layer_params[0]["w1"].shape[1]
    scale = float(D) ** (-0.5)           # matches Cross_Attention: dim ** -0.5

    stack = lambda name: jnp.stack([p[name] for p in layer_params])
    # Matmul weights streamed as bf16 (halves weight DMA, MXU-native).
    wq = stack("wq").astype(jnp.bfloat16)                       # (depth, D, inner)
    wk = stack("wk").astype(jnp.bfloat16)
    wv = stack("wv").astype(jnp.bfloat16)
    wo = stack("wo").astype(jnp.bfloat16).reshape(depth, heads, dim_head, D)
    w1 = stack("w1").astype(jnp.bfloat16)                       # (depth, D, mlp)
    w2 = stack("w2").astype(jnp.bfloat16)                       # (depth, mlp, D)
    # LayerNorm params / biases stay f32 (elementwise tail in f32; v5e-safe).
    g1, be1 = stack("g1"), stack("be1")                         # (depth, 1, D)
    bo, g2, be2 = stack("bo"), stack("g2"), stack("be2")
    b1, b2 = stack("b1"), stack("b2")

    kernel = functools.partial(decoder_kernel, heads=heads,
                               dim_head=dim_head, scale=scale)

    per_b = lambda b, l: (b, 0, 0)       # activation blocks (resident per b)
    per_l3 = lambda b, l: (l, 0, 0)      # per-layer weight blocks
    per_l4 = lambda b, l: (l, 0, 0, 0)

    return pl.pallas_call(
        kernel,
        out_shape=jax.ShapeDtypeStruct((B, N, D), x.dtype),
        grid_spec=pltpu.PrefetchScalarGridSpec(
            num_scalar_prefetch=0,
            grid=(B, depth),
            in_specs=[
                pl.BlockSpec((1, N, D), per_b),                 # x (read at layer 0)
                pl.BlockSpec((1, Nm, D), per_b),                # m
                pl.BlockSpec((1, 1, D), per_l3),                # ln1 gamma
                pl.BlockSpec((1, 1, D), per_l3),                # ln1 beta
                pl.BlockSpec((1, D, inner), per_l3),            # Wq
                pl.BlockSpec((1, D, inner), per_l3),            # Wk
                pl.BlockSpec((1, D, inner), per_l3),            # Wv
                pl.BlockSpec((1, heads, dim_head, D), per_l4),  # Wo (per head)
                pl.BlockSpec((1, 1, D), per_l3),                # bo
                pl.BlockSpec((1, 1, D), per_l3),                # ln2 gamma
                pl.BlockSpec((1, 1, D), per_l3),                # ln2 beta
                pl.BlockSpec((1, D, mlp), per_l3),              # W1
                pl.BlockSpec((1, 1, mlp), per_l3),              # b1
                pl.BlockSpec((1, mlp, D), per_l3),              # W2
                pl.BlockSpec((1, 1, D), per_l3),                # b2
            ],
            out_specs=pl.BlockSpec((1, N, D), per_b),
            scratch_shapes=[pltpu.VMEM((N, D), jnp.float32)],
        ),
        compiler_params=pltpu.CompilerParams(
            # B parallel (v7x megacore; no-op on v5e/v6e), depth sequential.
            dimension_semantics=("parallel", "arbitrary"),
            # Explicit budget; re-derive for production shapes per generation.
            vmem_limit_bytes=32 * 1024 * 1024,
        ),
    )(x, m, g1, be1, wq, wk, wv, wo, bo, g2, be2, w1, b1, w2, b2)


# ----------------------------------------------------------------------------
# Pure-JAX reference (f32, PyTorch math) for the correctness check.
# ----------------------------------------------------------------------------
def reference_decoder(x, m, layer_params, *, heads, dim_head):
    def layernorm(t, g, b):
        mu = jnp.mean(t, axis=-1, keepdims=True)
        var = jnp.mean((t - mu) ** 2, axis=-1, keepdims=True)
        return (t - mu) / jnp.sqrt(var + 1e-5) * g + b

    D = x.shape[-1]
    scale = D ** (-0.5)
    for p in layer_params:
        xn = layernorm(x, p["g1"], p["be1"])
        mn = layernorm(m, p["g1"], p["be1"])
        q = xn @ p["wq"]
        k = mn @ p["wk"]
        v = mn @ p["wv"]
        B, N, _ = q.shape
        Nm = k.shape[1]
        q = q.reshape(B, N, heads, dim_head).transpose(0, 2, 1, 3)
        k = k.reshape(B, Nm, heads, dim_head).transpose(0, 2, 1, 3)
        v = v.reshape(B, Nm, heads, dim_head).transpose(0, 2, 1, 3)
        dots = jnp.einsum("bhid,bhjd->bhij", q, k) * scale
        attn = jax.nn.softmax(dots, axis=-1)
        out = jnp.einsum("bhij,bhjd->bhid", attn, v)
        out = out.transpose(0, 2, 1, 3).reshape(B, N, heads * dim_head)
        out = out @ p["wo"] + p["bo"]
        x = x + out
        xn2 = layernorm(x, p["g2"], p["be2"])
        h = xn2 @ p["w1"] + p["b1"]
        h = 0.5 * h * (1.0 + jax.lax.erf(h / jnp.sqrt(2.0)))
        x = x + (h @ p["w2"] + p["b2"])
    return x


# ----------------------------------------------------------------------------
# Deterministic parameter init + run.
# ----------------------------------------------------------------------------
def init_params(key, depth, dim, heads, dim_head, mlp_dim):
    inner = heads * dim_head
    layers = []
    for i in range(depth):
        ks = jax.random.split(jax.random.fold_in(key, i), 6)
        std = 0.02
        layers.append({
            "g1": jnp.ones((1, dim), jnp.float32),
            "be1": jnp.zeros((1, dim), jnp.float32),
            "wq": std * jax.random.normal(ks[0], (dim, inner), jnp.float32),
            "wk": std * jax.random.normal(ks[1], (dim, inner), jnp.float32),
            "wv": std * jax.random.normal(ks[2], (dim, inner), jnp.float32),
            "wo": std * jax.random.normal(ks[3], (inner, dim), jnp.float32),
            "bo": jnp.zeros((1, dim), jnp.float32),
            "g2": jnp.ones((1, dim), jnp.float32),
            "be2": jnp.zeros((1, dim), jnp.float32),
            "w1": std * jax.random.normal(ks[4], (dim, mlp_dim), jnp.float32),
            "b1": jnp.zeros((1, mlp_dim), jnp.float32),
            "w2": std * jax.random.normal(ks[5], (mlp_dim, dim), jnp.float32),
            "b2": jnp.zeros((1, dim), jnp.float32),
        })
    return layers


if __name__ == "__main__":
    # Small shapes: dim=32, depth=2, heads=4, dim_head=8, mlp_dim=64
    B, N, NM, D = 2, 8, 8, 32
    DEPTH, HEADS, DIM_HEAD, MLP = 2, 4, 8, 64

    key = jax.random.PRNGKey(0)
    kx, km, kp = jax.random.split(key, 3)
    x = jax.random.normal(kx, (B, N, D), jnp.float32)     # target / query
    m = jax.random.normal(km, (B, NM, D), jnp.float32)    # memory

    params = init_params(kp, DEPTH, D, HEADS, DIM_HEAD, MLP)

    out = transformer_decoder(x, m, params, heads=HEADS, dim_head=DIM_HEAD)
    out = jax.block_until_ready(out)

    ref = reference_decoder(x, m, params, heads=HEADS, dim_head=DIM_HEAD)
    ref = jax.block_until_ready(ref)

    # bf16 matmul operands / weights + approx reciprocal -> relaxed tolerance.
    np.testing.assert_allclose(np.asarray(out), np.asarray(ref),
                               rtol=2e-2, atol=2e-2)
    print("KERNEL_OK")
</pallas_src>

<mosaic_0001>
module attributes {stable_mosaic.version = 11 : i64} {
  func.func @decoder_kernel(%arg0: i32, %arg1: i32, %arg2: memref<1x8x32xf32, #tpu.memory_space<vmem>>, %arg3: memref<1x8x32xf32, #tpu.memory_space<vmem>>, %arg4: memref<1x1x32xf32, #tpu.memory_space<vmem>>, %arg5: memref<1x1x32xf32, #tpu.memory_space<vmem>>, %arg6: memref<1x32x32xbf16, #tpu.memory_space<vmem>>, %arg7: memref<1x32x32xbf16, #tpu.memory_space<vmem>>, %arg8: memref<1x32x32xbf16, #tpu.memory_space<vmem>>, %arg9: memref<1x4x8x32xbf16, #tpu.memory_space<vmem>>, %arg10: memref<1x1x32xf32, #tpu.memory_space<vmem>>, %arg11: memref<1x1x32xf32, #tpu.memory_space<vmem>>, %arg12: memref<1x1x32xf32, #tpu.memory_space<vmem>>, %arg13: memref<1x32x64xbf16, #tpu.memory_space<vmem>>, %arg14: memref<1x1x64xf32, #tpu.memory_space<vmem>>, %arg15: memref<1x64x32xbf16, #tpu.memory_space<vmem>>, %arg16: memref<1x1x32xf32, #tpu.memory_space<vmem>>, %arg17: memref<1x8x32xf32, #tpu.memory_space<vmem>>, %arg18: memref<8x32xf32, #tpu.memory_space<vmem>>) attributes {dimension_semantics = [#tpu.dimension_semantics<parallel>, #tpu.dimension_semantics<arbitrary>], iteration_bounds = array<i64: 2, 2>, scalar_prefetch = 0 : i64, scratch_operands = 1 : i64, tpu.core_type = #tpu.core_type<tc>, window_params = [{transform_indices = @transform_0, window_bounds = array<i64: 1, 8, 32>}, {transform_indices = @transform_1, window_bounds = array<i64: 1, 8, 32>}, {transform_indices = @transform_2, window_bounds = array<i64: 1, 1, 32>}, {transform_indices = @transform_3, window_bounds = array<i64: 1, 1, 32>}, {transform_indices = @transform_4, window_bounds = array<i64: 1, 32, 32>}, {transform_indices = @transform_5, window_bounds = array<i64: 1, 32, 32>}, {transform_indices = @transform_6, window_bounds = array<i64: 1, 32, 32>}, {transform_indices = @transform_7, window_bounds = array<i64: 1, 4, 8, 32>}, {transform_indices = @transform_8, window_bounds = array<i64: 1, 1, 32>}, {transform_indices = @transform_9, window_bounds = array<i64: 1, 1, 32>}, {transform_indices = @transform_10, window_bounds = array<i64: 1, 1, 32>}, {transform_indices = @transform_11, window_bounds = array<i64: 1, 32, 64>}, {transform_indices = @transform_12, window_bounds = array<i64: 1, 1, 64>}, {transform_indices = @transform_13, window_bounds = array<i64: 1, 64, 32>}, {transform_indices = @transform_14, window_bounds = array<i64: 1, 1, 32>}, {transform_indices = @transform_15, window_bounds = array<i64: 1, 8, 32>}]} {
    %c0_i32 = arith.constant 0 : i32
    %0 = arith.cmpi eq, %arg1, %c0_i32 : i32
    %1 = arith.extui %0 : i1 to i32
    %c0_i32_0 = arith.constant 0 : i32
    %2 = arith.cmpi ne, %1, %c0_i32_0 : i32
    scf.if %2 {
      %c0_102 = arith.constant 0 : index
      %c0_103 = arith.constant 0 : index
      %c0_104 = arith.constant 0 : index
      %219 = vector.load %arg2[%c0_102, %c0_103, %c0_104] : memref<1x8x32xf32, #tpu.memory_space<vmem>>, vector<1x8x32xf32>
      %220 = vector.shape_cast %219 : vector<1x8x32xf32> to vector<8x32xf32>
      %c0_105 = arith.constant 0 : index
      %c0_106 = arith.constant 0 : index
      %221 = vector.load %arg18[%c0_105, %c0_106] : memref<8x32xf32, #tpu.memory_space<vmem>>, vector<8x32xf32>
      tpu.vector_store %arg18[%c0_105, %c0_106], %220 {strides = array<i32>} : memref<8x32xf32, #tpu.memory_space<vmem>>, vector<8x32xf32>,
    } else {
    }
    %c0 = arith.constant 0 : index
    %c0_1 = arith.constant 0 : index
    %3 = vector.load %arg18[%c0, %c0_1] : memref<8x32xf32, #tpu.memory_space<vmem>>, vector<8x32xf32>
    %c0_2 = arith.constant 0 : index
    %c0_3 = arith.constant 0 : index
    %c0_4 = arith.constant 0 : index
    %4 = vector.load %arg3[%c0_2, %c0_3, %c0_4] : memref<1x8x32xf32, #tpu.memory_space<vmem>>, vector<1x8x32xf32>
    %5 = vector.shape_cast %4 : vector<1x8x32xf32> to vector<8x32xf32>
    %c0_5 = arith.constant 0 : index
    %c0_6 = arith.constant 0 : index
    %c0_7 = arith.constant 0 : index
    %6 = vector.load %arg4[%c0_5, %c0_6, %c0_7] : memref<1x1x32xf32, #tpu.memory_space<vmem>>, vector<1x1x32xf32>
    %7 = vector.shape_cast %6 : vector<1x1x32xf32> to vector<1x32xf32>
    %c0_8 = arith.constant 0 : index
    %c0_9 = arith.constant 0 : index
    %c0_10 = arith.constant 0 : index
    %8 = vector.load %arg5[%c0_8, %c0_9, %c0_10] : memref<1x1x32xf32, #tpu.memory_space<vmem>>, vector<1x1x32xf32>
    %9 = vector.shape_cast %8 : vector<1x1x32xf32> to vector<1x32xf32>
    %cst = arith.constant dense<0.000000e+00> : vector<8xf32>
    %10 = vector.multi_reduction <add>, %3, %cst [1] : vector<8x32xf32> to vector<8xf32>
    %11 = vector.shape_cast %10 : vector<8xf32> to vector<8x1xf32>
    %cst_11 = arith.constant 3.200000e+01 : f32
    %12 = vector.broadcast %cst_11 : f32 to vector<8x1xf32>
    %13 = arith.divf %11, %12 : vector<8x1xf32>
    %14 = vector.broadcast %13 : vector<8x1xf32> to vector<8x32xf32>
    %15 = arith.subf %3, %14 : vector<8x32xf32>
    %16 = vector.broadcast %13 : vector<8x1xf32> to vector<8x32xf32>
    %17 = arith.subf %3, %16 : vector<8x32xf32>
    %18 = arith.mulf %15, %17 : vector<8x32xf32>
    %cst_12 = arith.constant dense<0.000000e+00> : vector<8xf32>
    %19 = vector.multi_reduction <add>, %18, %cst_12 [1] : vector<8x32xf32> to vector<8xf32>
    %20 = vector.shape_cast %19 : vector<8xf32> to vector<8x1xf32>
    %cst_13 = arith.constant 3.200000e+01 : f32
    %21 = vector.broadcast %cst_13 : f32 to vector<8x1xf32>
    %22 = arith.divf %20, %21 : vector<8x1xf32>
    %23 = vector.broadcast %13 : vector<8x1xf32> to vector<8x32xf32>
    %24 = arith.subf %3, %23 : vector<8x32xf32>
    %cst_14 = arith.constant 9.99999974E-6 : f32
    %25 = vector.broadcast %cst_14 : f32 to vector<8x1xf32>
    %26 = arith.addf %22, %25 : vector<8x1xf32>
    %27 = math.rsqrt %26 : vector<8x1xf32>
    %28 = vector.broadcast %27 : vector<8x1xf32> to vector<8x32xf32>
    %29 = arith.mulf %24, %28 : vector<8x32xf32>
    %30 = vector.broadcast %7 : vector<1x32xf32> to vector<8x32xf32>
    %31 = arith.mulf %29, %30 : vector<8x32xf32>
    %32 = vector.broadcast %9 : vector<1x32xf32> to vector<8x32xf32>
    %33 = arith.addf %31, %32 : vector<8x32xf32>
    %34 = arith.truncf %33 : vector<8x32xf32> to vector<8x32xbf16>
    %cst_15 = arith.constant dense<0.000000e+00> : vector<8xf32>
    %35 = vector.multi_reduction <add>, %5, %cst_15 [1] : vector<8x32xf32> to vector<8xf32>
    %36 = vector.shape_cast %35 : vector<8xf32> to vector<8x1xf32>
    %cst_16 = arith.constant 3.200000e+01 : f32
    %37 = vector.broadcast %cst_16 : f32 to vector<8x1xf32>
    %38 = arith.divf %36, %37 : vector<8x1xf32>
    %39 = vector.broadcast %38 : vector<8x1xf32> to vector<8x32xf32>
    %40 = arith.subf %5, %39 : vector<8x32xf32>
    %41 = vector.broadcast %38 : vector<8x1xf32> to vector<8x32xf32>
    %42 = arith.subf %5, %41 : vector<8x32xf32>
    %43 = arith.mulf %40, %42 : vector<8x32xf32>
    %cst_17 = arith.constant dense<0.000000e+00> : vector<8xf32>
    %44 = vector.multi_reduction <add>, %43, %cst_17 [1] : vector<8x32xf32> to vector<8xf32>
    %45 = vector.shape_cast %44 : vector<8xf32> to vector<8x1xf32>
    %cst_18 = arith.constant 3.200000e+01 : f32
    %46 = vector.broadcast %cst_18 : f32 to vector<8x1xf32>
    %47 = arith.divf %45, %46 : vector<8x1xf32>
    %48 = vector.broadcast %38 : vector<8x1xf32> to vector<8x32xf32>
    %49 = arith.subf %5, %48 : vector<8x32xf32>
    %cst_19 = arith.constant 9.99999974E-6 : f32
    %50 = vector.broadcast %cst_19 : f32 to vector<8x1xf32>
    %51 = arith.addf %47, %50 : vector<8x1xf32>
    %52 = math.rsqrt %51 : vector<8x1xf32>
    %53 = vector.broadcast %52 : vector<8x1xf32> to vector<8x32xf32>
    %54 = arith.mulf %49, %53 : vector<8x32xf32>
    %55 = vector.broadcast %7 : vector<1x32xf32> to vector<8x32xf32>
    %56 = arith.mulf %54, %55 : vector<8x32xf32>
    %57 = vector.broadcast %9 : vector<1x32xf32> to vector<8x32xf32>
    %58 = arith.addf %56, %57 : vector<8x32xf32>
    %59 = arith.truncf %58 : vector<8x32xf32> to vector<8x32xbf16>
    %c0_20 = arith.constant 0 : index
    %c0_21 = arith.constant 0 : index
    %c0_22 = arith.constant 0 : index
    %60 = vector.load %arg6[%c0_20, %c0_21, %c0_22] : memref<1x32x32xbf16, #tpu.memory_space<vmem>>, vector<1x32x32xbf16>
    %61 = vector.shape_cast %60 : vector<1x32x32xbf16> to vector<32x32xbf16>
    %cst_23 = arith.constant dense<0.000000e+00> : vector<8x32xf32>
    %62 = tpu.matmul %34, %61, %cst_23 {dimension_numbers = #tpu.dot_dimension_numbers<[1], [0], [0], [1], [0, 0, 1, 1], [], []>} : vector<8x32xbf16>, vector<32x32xbf16>, vector<8x32xf32> -> vector<8x32xf32>
    %cst_24 = arith.constant 0.176776692 : f32
    %63 = vector.broadcast %cst_24 : f32 to vector<8x32xf32>
    %64 = arith.mulf %62, %63 : vector<8x32xf32>
    %c0_25 = arith.constant 0 : index
    %c0_26 = arith.constant 0 : index
    %c0_27 = arith.constant 0 : index
    %65 = vector.load %arg7[%c0_25, %c0_26, %c0_27] : memref<1x32x32xbf16, #tpu.memory_space<vmem>>, vector<1x32x32xbf16>
    %66 = vector.shape_cast %65 : vector<1x32x32xbf16> to vector<32x32xbf16>
    %cst_28 = arith.constant dense<0.000000e+00> : vector<8x32xf32>
    %67 = tpu.matmul %59, %66, %cst_28 {dimension_numbers = #tpu.dot_dimension_numbers<[1], [0], [0], [1], [0, 0, 1, 1], [], []>} : vector<8x32xbf16>, vector<32x32xbf16>, vector<8x32xf32> -> vector<8x32xf32>
    %c0_29 = arith.constant 0 : index
    %c0_30 = arith.constant 0 : index
    %c0_31 = arith.constant 0 : index
    %68 = vector.load %arg8[%c0_29, %c0_30, %c0_31] : memref<1x32x32xbf16, #tpu.memory_space<vmem>>, vector<1x32x32xbf16>
    %69 = vector.shape_cast %68 : vector<1x32x32xbf16> to vector<32x32xbf16>
    %cst_32 = arith.constant dense<0.000000e+00> : vector<8x32xf32>
    %70 = tpu.matmul %59, %69, %cst_32 {dimension_numbers = #tpu.dot_dimension_numbers<[1], [0], [0], [1], [0, 0, 1, 1], [], []>} : vector<8x32xbf16>, vector<32x32xbf16>, vector<8x32xf32> -> vector<8x32xf32>
    %71 = arith.truncf %64 : vector<8x32xf32> to vector<8x32xbf16>
    %72 = arith.truncf %67 : vector<8x32xf32> to vector<8x32xbf16>
    %73 = arith.truncf %70 : vector<8x32xf32> to vector<8x32xbf16>
    %74 = vector.extract_strided_slice %71 {offsets = [0, 0], sizes = [8, 8], strides = [1, 1]} : vector<8x32xbf16> to vector<8x8xbf16>
    %75 = vector.extract_strided_slice %72 {offsets = [0, 0], sizes = [8, 8], strides = [1, 1]} : vector<8x32xbf16> to vector<8x8xbf16>
    %76 = vector.extract_strided_slice %73 {offsets = [0, 0], sizes = [8, 8], strides = [1, 1]} : vector<8x32xbf16> to vector<8x8xbf16>
    %cst_33 = arith.constant dense<0.000000e+00> : vector<8x8xf32>
    %77 = tpu.matmul %74, %75, %cst_33 {dimension_numbers = #tpu.dot_dimension_numbers<[1], [1], [0], [0], [0, 0, 1, 0], [], []>} : vector<8x8xbf16>, vector<8x8xbf16>, vector<8x8xf32> -> vector<8x8xf32>
    %cst_34 = arith.constant dense<0xFF800000> : vector<8xf32>
    %78 = vector.multi_reduction <maximumf>, %77, %cst_34 [1] : vector<8x8xf32> to vector<8xf32>
    %79 = vector.shape_cast %78 : vector<8xf32> to vector<8x1xf32>
    %80 = vector.broadcast %79 : vector<8x1xf32> to vector<8x8xf32>
    %81 = arith.subf %77, %80 : vector<8x8xf32>
    %82 = math.exp %81 : vector<8x8xf32>
    %cst_35 = arith.constant dense<0.000000e+00> : vector<8xf32>
    %83 = vector.multi_reduction <add>, %82, %cst_35 [1] : vector<8x8xf32> to vector<8xf32>
    %84 = vector.shape_cast %83 : vector<8xf32> to vector<8x1xf32>
    %85 = tpu.reciprocal %84 {approx = true} : vector<8x1xf32> -> vector<8x1xf32>
    %86 = vector.broadcast %85 : vector<8x1xf32> to vector<8x8xf32>
    %87 = arith.mulf %82, %86 : vector<8x8xf32>
    %88 = arith.truncf %87 : vector<8x8xf32> to vector<8x8xbf16>
    %cst_36 = arith.constant dense<0.000000e+00> : vector<8x8xf32>
    %89 = tpu.matmul %88, %76, %cst_36 {dimension_numbers = #tpu.dot_dimension_numbers<[1], [0], [0], [1], [0, 0, 1, 1], [], []>} : vector<8x8xbf16>, vector<8x8xbf16>, vector<8x8xf32> -> vector<8x8xf32>
    %90 = arith.truncf %89 : vector<8x8xf32> to vector<8x8xbf16>
    %c0_37 = arith.constant 0 : index
    %c0_38 = arith.constant 0 : index
    %c0_39 = arith.constant 0 : index
    %c0_40 = arith.constant 0 : index
    %91 = vector.load %arg9[%c0_37, %c0_38, %c0_39, %c0_40] : memref<1x4x8x32xbf16, #tpu.memory_space<vmem>>, vector<1x1x8x32xbf16>
    %92 = vector.shape_cast %91 : vector<1x1x8x32xbf16> to vector<8x32xbf16>
    %cst_41 = arith.constant dense<0.000000e+00> : vector<8x32xf32>
    %93 = tpu.matmul %90, %92, %cst_41 {dimension_numbers = #tpu.dot_dimension_numbers<[1], [0], [0], [1], [0, 0, 1, 1], [], []>} : vector<8x8xbf16>, vector<8x32xbf16>, vector<8x32xf32> -> vector<8x32xf32>
    %94 = vector.extract_strided_slice %71 {offsets = [0, 8], sizes = [8, 8], strides = [1, 1]} : vector<8x32xbf16> to vector<8x8xbf16>
    %95 = vector.extract_strided_slice %72 {offsets = [0, 8], sizes = [8, 8], strides = [1, 1]} : vector<8x32xbf16> to vector<8x8xbf16>
    %96 = vector.extract_strided_slice %73 {offsets = [0, 8], sizes = [8, 8], strides = [1, 1]} : vector<8x32xbf16> to vector<8x8xbf16>
    %cst_42 = arith.constant dense<0.000000e+00> : vector<8x8xf32>
    %97 = tpu.matmul %94, %95, %cst_42 {dimension_numbers = #tpu.dot_dimension_numbers<[1], [1], [0], [0], [0, 0, 1, 0], [], []>} : vector<8x8xbf16>, vector<8x8xbf16>, vector<8x8xf32> -> vector<8x8xf32>
    %cst_43 = arith.constant dense<0xFF800000> : vector<8xf32>
    %98 = vector.multi_reduction <maximumf>, %97, %cst_43 [1] : vector<8x8xf32> to vector<8xf32>
    %99 = vector.shape_cast %98 : vector<8xf32> to vector<8x1xf32>
    %100 = vector.broadcast %99 : vector<8x1xf32> to vector<8x8xf32>
    %101 = arith.subf %97, %100 : vector<8x8xf32>
    %102 = math.exp %101 : vector<8x8xf32>
    %cst_44 = arith.constant dense<0.000000e+00> : vector<8xf32>
    %103 = vector.multi_reduction <add>, %102, %cst_44 [1] : vector<8x8xf32> to vector<8xf32>
    %104 = vector.shape_cast %103 : vector<8xf32> to vector<8x1xf32>
    %105 = tpu.reciprocal %104 {approx = true} : vector<8x1xf32> -> vector<8x1xf32>
    %106 = vector.broadcast %105 : vector<8x1xf32> to vector<8x8xf32>
    %107 = arith.mulf %102, %106 : vector<8x8xf32>
    %108 = arith.truncf %107 : vector<8x8xf32> to vector<8x8xbf16>
    %cst_45 = arith.constant dense<0.000000e+00> : vector<8x8xf32>
    %109 = tpu.matmul %108, %96, %cst_45 {dimension_numbers = #tpu.dot_dimension_numbers<[1], [0], [0], [1], [0, 0, 1, 1], [], []>} : vector<8x8xbf16>, vector<8x8xbf16>, vector<8x8xf32> -> vector<8x8xf32>
    %110 = arith.truncf %109 : vector<8x8xf32> to vector<8x8xbf16>
    %c0_46 = arith.constant 0 : index
    %c1 = arith.constant 1 : index
    %c0_47 = arith.constant 0 : index
    %c0_48 = arith.constant 0 : index
    %111 = vector.load %arg9[%c0_46, %c1, %c0_47, %c0_48] : memref<1x4x8x32xbf16, #tpu.memory_space<vmem>>, vector<1x1x8x32xbf16>
    %112 = vector.shape_cast %111 : vector<1x1x8x32xbf16> to vector<8x32xbf16>
    %cst_49 = arith.constant dense<0.000000e+00> : vector<8x32xf32>
    %113 = tpu.matmul %110, %112, %cst_49 {dimension_numbers = #tpu.dot_dimension_numbers<[1], [0], [0], [1], [0, 0, 1, 1], [], []>} : vector<8x8xbf16>, vector<8x32xbf16>, vector<8x32xf32> -> vector<8x32xf32>
    %114 = arith.addf %93, %113 : vector<8x32xf32>
    %115 = vector.extract_strided_slice %71 {offsets = [0, 16], sizes = [8, 8], strides = [1, 1]} : vector<8x32xbf16> to vector<8x8xbf16>
    %116 = vector.extract_strided_slice %72 {offsets = [0, 16], sizes = [8, 8], strides = [1, 1]} : vector<8x32xbf16> to vector<8x8xbf16>
    %117 = vector.extract_strided_slice %73 {offsets = [0, 16], sizes = [8, 8], strides = [1, 1]} : vector<8x32xbf16> to vector<8x8xbf16>
    %cst_50 = arith.constant dense<0.000000e+00> : vector<8x8xf32>
    %118 = tpu.matmul %115, %116, %cst_50 {dimension_numbers = #tpu.dot_dimension_numbers<[1], [1], [0], [0], [0, 0, 1, 0], [], []>} : vector<8x8xbf16>, vector<8x8xbf16>, vector<8x8xf32> -> vector<8x8xf32>
    %cst_51 = arith.constant dense<0xFF800000> : vector<8xf32>
    %119 = vector.multi_reduction <maximumf>, %118, %cst_51 [1] : vector<8x8xf32> to vector<8xf32>
    %120 = vector.shape_cast %119 : vector<8xf32> to vector<8x1xf32>
    %121 = vector.broadcast %120 : vector<8x1xf32> to vector<8x8xf32>
    %122 = arith.subf %118, %121 : vector<8x8xf32>
    %123 = math.exp %122 : vector<8x8xf32>
    %cst_52 = arith.constant dense<0.000000e+00> : vector<8xf32>
    %124 = vector.multi_reduction <add>, %123, %cst_52 [1] : vector<8x8xf32> to vector<8xf32>
    %125 = vector.shape_cast %124 : vector<8xf32> to vector<8x1xf32>
    %126 = tpu.reciprocal %125 {approx = true} : vector<8x1xf32> -> vector<8x1xf32>
    %127 = vector.broadcast %126 : vector<8x1xf32> to vector<8x8xf32>
    %128 = arith.mulf %123, %127 : vector<8x8xf32>
    %129 = arith.truncf %128 : vector<8x8xf32> to vector<8x8xbf16>
    %cst_53 = arith.constant dense<0.000000e+00> : vector<8x8xf32>
    %130 = tpu.matmul %129, %117, %cst_53 {dimension_numbers = #tpu.dot_dimension_numbers<[1], [0], [0], [1], [0, 0, 1, 1], [], []>} : vector<8x8xbf16>, vector<8x8xbf16>, vector<8x8xf32> -> vector<8x8xf32>
    %131 = arith.truncf %130 : vector<8x8xf32> to vector<8x8xbf16>
    %c0_54 = arith.constant 0 : index
    %c2 = arith.constant 2 : index
    %c0_55 = arith.constant 0 : index
    %c0_56 = arith.constant 0 : index
    %132 = vector.load %arg9[%c0_54, %c2, %c0_55, %c0_56] : memref<1x4x8x32xbf16, #tpu.memory_space<vmem>>, vector<1x1x8x32xbf16>
    %133 = vector.shape_cast %132 : vector<1x1x8x32xbf16> to vector<8x32xbf16>
    %cst_57 = arith.constant dense<0.000000e+00> : vector<8x32xf32>
    %134 = tpu.matmul %131, %133, %cst_57 {dimension_numbers = #tpu.dot_dimension_numbers<[1], [0], [0], [1], [0, 0, 1, 1], [], []>} : vector<8x8xbf16>, vector<8x32xbf16>, vector<8x32xf32> -> vector<8x32xf32>
    %135 = arith.addf %114, %134 : vector<8x32xf32>
    %136 = vector.extract_strided_slice %71 {offsets = [0, 24], sizes = [8, 8], strides = [1, 1]} : vector<8x32xbf16> to vector<8x8xbf16>
    %137 = vector.extract_strided_slice %72 {offsets = [0, 24], sizes = [8, 8], strides = [1, 1]} : vector<8x32xbf16> to vector<8x8xbf16>
    %138 = vector.extract_strided_slice %73 {offsets = [0, 24], sizes = [8, 8], strides = [1, 1]} : vector<8x32xbf16> to vector<8x8xbf16>
    %cst_58 = arith.constant dense<0.000000e+00> : vector<8x8xf32>
    %139 = tpu.matmul %136, %137, %cst_58 {dimension_numbers = #tpu.dot_dimension_numbers<[1], [1], [0], [0], [0, 0, 1, 0], [], []>} : vector<8x8xbf16>, vector<8x8xbf16>, vector<8x8xf32> -> vector<8x8xf32>
    %cst_59 = arith.constant dense<0xFF800000> : vector<8xf32>
    %140 = vector.multi_reduction <maximumf>, %139, %cst_59 [1] : vector<8x8xf32> to vector<8xf32>
    %141 = vector.shape_cast %140 : vector<8xf32> to vector<8x1xf32>
    %142 = vector.broadcast %141 : vector<8x1xf32> to vector<8x8xf32>
    %143 = arith.subf %139, %142 : vector<8x8xf32>
    %144 = math.exp %143 : vector<8x8xf32>
    %cst_60 = arith.constant dense<0.000000e+00> : vector<8xf32>
    %145 = vector.multi_reduction <add>, %144, %cst_60 [1] : vector<8x8xf32> to vector<8xf32>
    %146 = vector.shape_cast %145 : vector<8xf32> to vector<8x1xf32>
    %147 = tpu.reciprocal %146 {approx = true} : vector<8x1xf32> -> vector<8x1xf32>
    %148 = vector.broadcast %147 : vector<8x1xf32> to vector<8x8xf32>
    %149 = arith.mulf %144, %148 : vector<8x8xf32>
    %150 = arith.truncf %149 : vector<8x8xf32> to vector<8x8xbf16>
    %cst_61 = arith.constant dense<0.000000e+00> : vector<8x8xf32>
    %151 = tpu.matmul %150, %138, %cst_61 {dimension_numbers = #tpu.dot_dimension_numbers<[1], [0], [0], [1], [0, 0, 1, 1], [], []>} : vector<8x8xbf16>, vector<8x8xbf16>, vector<8x8xf32> -> vector<8x8xf32>
    %152 = arith.truncf %151 : vector<8x8xf32> to vector<8x8xbf16>
    %c0_62 = arith.constant 0 : index
    %c3 = arith.constant 3 : index
    %c0_63 = arith.constant 0 : index
    %c0_64 = arith.constant 0 : index
    %153 = vector.load %arg9[%c0_62, %c3, %c0_63, %c0_64] : memref<1x4x8x32xbf16, #tpu.memory_space<vmem>>, vector<1x1x8x32xbf16>
    %154 = vector.shape_cast %153 : vector<1x1x8x32xbf16> to vector<8x32xbf16>
    %cst_65 = arith.constant dense<0.000000e+00> : vector<8x32xf32>
    %155 = tpu.matmul %152, %154, %cst_65 {dimension_numbers = #tpu.dot_dimension_numbers<[1], [0], [0], [1], [0, 0, 1, 1], [], []>} : vector<8x8xbf16>, vector<8x32xbf16>, vector<8x32xf32> -> vector<8x32xf32>
    %156 = arith.addf %135, %155 : vector<8x32xf32>
    %157 = arith.addf %3, %156 : vector<8x32xf32>
    %c0_66 = arith.constant 0 : index
    %c0_67 = arith.constant 0 : index
    %c0_68 = arith.constant 0 : index
    %158 = vector.load %arg10[%c0_66, %c0_67, %c0_68] : memref<1x1x32xf32, #tpu.memory_space<vmem>>, vector<1x1x32xf32>
    %159 = vector.shape_cast %158 : vector<1x1x32xf32> to vector<1x32xf32>
    %160 = vector.broadcast %159 : vector<1x32xf32> to vector<8x32xf32>
    %161 = arith.addf %157, %160 : vector<8x32xf32>
    %c0_69 = arith.constant 0 : index
    %c0_70 = arith.constant 0 : index
    %c0_71 = arith.constant 0 : index
    %162 = vector.load %arg11[%c0_69, %c0_70, %c0_71] : memref<1x1x32xf32, #tpu.memory_space<vmem>>, vector<1x1x32xf32>
    %163 = vector.shape_cast %162 : vector<1x1x32xf32> to vector<1x32xf32>
    %c0_72 = arith.constant 0 : index
    %c0_73 = arith.constant 0 : index
    %c0_74 = arith.constant 0 : index
    %164 = vector.load %arg12[%c0_72, %c0_73, %c0_74] : memref<1x1x32xf32, #tpu.memory_space<vmem>>, vector<1x1x32xf32>
    %165 = vector.shape_cast %164 : vector<1x1x32xf32> to vector<1x32xf32>
    %cst_75 = arith.constant dense<0.000000e+00> : vector<8xf32>
    %166 = vector.multi_reduction <add>, %161, %cst_75 [1] : vector<8x32xf32> to vector<8xf32>
    %167 = vector.shape_cast %166 : vector<8xf32> to vector<8x1xf32>
    %cst_76 = arith.constant 3.200000e+01 : f32
    %168 = vector.broadcast %cst_76 : f32 to vector<8x1xf32>
    %169 = arith.divf %167, %168 : vector<8x1xf32>
    %170 = vector.broadcast %169 : vector<8x1xf32> to vector<8x32xf32>
    %171 = arith.subf %161, %170 : vector<8x32xf32>
    %172 = vector.broadcast %169 : vector<8x1xf32> to vector<8x32xf32>
    %173 = arith.subf %161, %172 : vector<8x32xf32>
    %174 = arith.mulf %171, %173 : vector<8x32xf32>
    %cst_77 = arith.constant dense<0.000000e+00> : vector<8xf32>
    %175 = vector.multi_reduction <add>, %174, %cst_77 [1] : vector<8x32xf32> to vector<8xf32>
    %176 = vector.shape_cast %175 : vector<8xf32> to vector<8x1xf32>
    %cst_78 = arith.constant 3.200000e+01 : f32
    %177 = vector.broadcast %cst_78 : f32 to vector<8x1xf32>
    %178 = arith.divf %176, %177 : vector<8x1xf32>
    %179 = vector.broadcast %169 : vector<8x1xf32> to vector<8x32xf32>
    %180 = arith.subf %161, %179 : vector<8x32xf32>
    %cst_79 = arith.constant 9.99999974E-6 : f32
    %181 = vector.broadcast %cst_79 : f32 to vector<8x1xf32>
    %182 = arith.addf %178, %181 : vector<8x1xf32>
    %183 = math.rsqrt %182 : vector<8x1xf32>
    %184 = vector.broadcast %183 : vector<8x1xf32> to vector<8x32xf32>
    %185 = arith.mulf %180, %184 : vector<8x32xf32>
    %186 = vector.broadcast %163 : vector<1x32xf32> to vector<8x32xf32>
    %187 = arith.mulf %185, %186 : vector<8x32xf32>
    %188 = vector.broadcast %165 : vector<1x32xf32> to vector<8x32xf32>
    %189 = arith.addf %187, %188 : vector<8x32xf32>
    %190 = arith.truncf %189 : vector<8x32xf32> to vector<8x32xbf16>
    %c0_80 = arith.constant 0 : index
    %c0_81 = arith.constant 0 : index
    %c0_82 = arith.constant 0 : index
    %191 = vector.load %arg13[%c0_80, %c0_81, %c0_82] : memref<1x32x64xbf16, #tpu.memory_space<vmem>>, vector<1x32x64xbf16>
    %192 = vector.shape_cast %191 : vector<1x32x64xbf16> to vector<32x64xbf16>
    %cst_83 = arith.constant dense<0.000000e+00> : vector<8x64xf32>
    %193 = tpu.matmul %190, %192, %cst_83 {dimension_numbers = #tpu.dot_dimension_numbers<[1], [0], [0], [1], [0, 0, 1, 1], [], []>} : vector<8x32xbf16>, vector<32x64xbf16>, vector<8x64xf32> -> vector<8x64xf32>
    %c0_84 = arith.constant 0 : index
    %c0_85 = arith.constant 0 : index
    %c0_86 = arith.constant 0 : index
    %194 = vector.load %arg14[%c0_84, %c0_85, %c0_86] : memref<1x1x64xf32, #tpu.memory_space<vmem>>, vector<1x1x64xf32>
    %195 = vector.shape_cast %194 : vector<1x1x64xf32> to vector<1x64xf32>
    %196 = vector.broadcast %195 : vector<1x64xf32> to vector<8x64xf32>
    %197 = arith.addf %193, %196 : vector<8x64xf32>
    %cst_87 = arith.constant 5.000000e-01 : f32
    %198 = vector.broadcast %cst_87 : f32 to vector<8x64xf32>
    %199 = arith.mulf %198, %197 : vector<8x64xf32>
    %cst_88 = arith.constant 0.707106769 : f32
    %200 = vector.broadcast %cst_88 : f32 to vector<8x64xf32>
    %201 = arith.mulf %197, %200 : vector<8x64xf32>
    %202 = math.erf %201 : vector<8x64xf32>
    %cst_89 = arith.constant 1.000000e+00 : f32
    %203 = vector.broadcast %cst_89 : f32 to vector<8x64xf32>
    %204 = arith.addf %203, %202 : vector<8x64xf32>
    %205 = arith.mulf %199, %204 : vector<8x64xf32>
    %206 = arith.truncf %205 : vector<8x64xf32> to vector<8x64xbf16>
    %c0_90 = arith.constant 0 : index
    %c0_91 = arith.constant 0 : index
    %c0_92 = arith.constant 0 : index
    %207 = vector.load %arg15[%c0_90, %c0_91, %c0_92] : memref<1x64x32xbf16, #tpu.memory_space<vmem>>, vector<1x64x32xbf16>
    %208 = vector.shape_cast %207 : vector<1x64x32xbf16> to vector<64x32xbf16>
    %cst_93 = arith.constant dense<0.000000e+00> : vector<8x32xf32>
    %209 = tpu.matmul %206, %208, %cst_93 {dimension_numbers = #tpu.dot_dimension_numbers<[1], [0], [0], [1], [0, 0, 1, 1], [], []>} : vector<8x64xbf16>, vector<64x32xbf16>, vector<8x32xf32> -> vector<8x32xf32>
    %c0_94 = arith.constant 0 : index
    %c0_95 = arith.constant 0 : index
    %c0_96 = arith.constant 0 : index
    %210 = vector.load %arg16[%c0_94, %c0_95, %c0_96] : memref<1x1x32xf32, #tpu.memory_space<vmem>>, vector<1x1x32xf32>
    %211 = vector.shape_cast %210 : vector<1x1x32xf32> to vector<1x32xf32>
    %212 = vector.broadcast %211 : vector<1x32xf32> to vector<8x32xf32>
    %213 = arith.addf %209, %212 : vector<8x32xf32>
    %214 = arith.addf %161, %213 : vector<8x32xf32>
    %c0_97 = arith.constant 0 : index
    %c0_98 = arith.constant 0 : index
    %215 = vector.load %arg18[%c0_97, %c0_98] : memref<8x32xf32, #tpu.memory_space<vmem>>, vector<8x32xf32>
    tpu.vector_store %arg18[%c0_97, %c0_98], %214 {strides = array<i32>} : memref<8x32xf32, #tpu.memory_space<vmem>>, vector<8x32xf32>,
    %c0_99 = arith.constant 0 : index
    %c0_100 = arith.constant 0 : index
    %c0_101 = arith.constant 0 : index
    %216 = vector.load %arg17[%c0_99, %c0_100, %c0_101] : memref<1x8x32xf32, #tpu.memory_space<vmem>>, vector<1x8x32xf32>
    %217 = vector.shape_cast %216 : vector<1x8x32xf32> to vector<8x32xf32>
    %218 = vector.shape_cast %214 : vector<8x32xf32> to vector<1x8x32xf32>
    tpu.vector_store %arg17[%c0_99, %c0_100, %c0_101], %218 {strides = array<i32>} : memref<1x8x32xf32, #tpu.memory_space<vmem>>, vector<1x8x32xf32>,
    return
  }
  func.func @transform_0(%arg0: i32, %arg1: i32) -> (i32, i32, i32) {
    %c0_i32 = arith.constant 0 : i32
    %c0_i32_0 = arith.constant 0 : i32
    %c0_i32_1 = arith.constant 0 : i32
    return %arg0, %c0_i32, %c0_i32_0 : i32, i32, i32
  }
  func.func @transform_1(%arg0: i32, %arg1: i32) -> (i32, i32, i32) {
    %c0_i32 = arith.constant 0 : i32
    %c0_i32_0 = arith.constant 0 : i32
    %c0_i32_1 = arith.constant 0 : i32
    return %arg0, %c0_i32, %c0_i32_0 : i32, i32, i32
  }
  func.func @transform_2(%arg0: i32, %arg1: i32) -> (i32, i32, i32) {
    %c0_i32 = arith.constant 0 : i32
    %c0_i32_0 = arith.constant 0 : i32
    %c0_i32_1 = arith.constant 0 : i32
    return %arg1, %c0_i32, %c0_i32_0 : i32, i32, i32
  }
  func.func @transform_3(%arg0: i32, %arg1: i32) -> (i32, i32, i32) {
    %c0_i32 = arith.constant 0 : i32
    %c0_i32_0 = arith.constant 0 : i32
    %c0_i32_1 = arith.constant 0 : i32
    return %arg1, %c0_i32, %c0_i32_0 : i32, i32, i32
  }
  func.func @transform_4(%arg0: i32, %arg1: i32) -> (i32, i32, i32) {
    %c0_i32 = arith.constant 0 : i32
    %c0_i32_0 = arith.constant 0 : i32
    %c0_i32_1 = arith.constant 0 : i32
    return %arg1, %c0_i32, %c0_i32_0 : i32, i32, i32
  }
  func.func @transform_5(%arg0: i32, %arg1: i32) -> (i32, i32, i32) {
    %c0_i32 = arith.constant 0 : i32
    %c0_i32_0 = arith.constant 0 : i32
    %c0_i32_1 = arith.constant 0 : i32
    return %arg1, %c0_i32, %c0_i32_0 : i32, i32, i32
  }
  func.func @transform_6(%arg0: i32, %arg1: i32) -> (i32, i32, i32) {
    %c0_i32 = arith.constant 0 : i32
    %c0_i32_0 = arith.constant 0 : i32
    %c0_i32_1 = arith.constant 0 : i32
    return %arg1, %c0_i32, %c0_i32_0 : i32, i32, i32
  }
  func.func @transform_7(%arg0: i32, %arg1: i32) -> (i32, i32, i32, i32) {
    %c0_i32 = arith.constant 0 : i32
    %c0_i32_0 = arith.constant 0 : i32
    %c0_i32_1 = arith.constant 0 : i32
    %c0_i32_2 = arith.constant 0 : i32
    return %arg1, %c0_i32, %c0_i32_0, %c0_i32_1 : i32, i32, i32, i32
  }
  func.func @transform_8(%arg0: i32, %arg1: i32) -> (i32, i32, i32) {
    %c0_i32 = arith.constant 0 : i32
    %c0_i32_0 = arith.constant 0 : i32
    %c0_i32_1 = arith.constant 0 : i32
    return %arg1, %c0_i32, %c0_i32_0 : i32, i32, i32
  }
  func.func @transform_9(%arg0: i32, %arg1: i32) -> (i32, i32, i32) {
    %c0_i32 = arith.constant 0 : i32
    %c0_i32_0 = arith.constant 0 : i32
    %c0_i32_1 = arith.constant 0 : i32
    return %arg1, %c0_i32, %c0_i32_0 : i32, i32, i32
  }
  func.func @transform_10(%arg0: i32, %arg1: i32) -> (i32, i32, i32) {
    %c0_i32 = arith.constant 0 : i32
    %c0_i32_0 = arith.constant 0 : i32
    %c0_i32_1 = arith.constant 0 : i32
    return %arg1, %c0_i32, %c0_i32_0 : i32, i32, i32
  }
  func.func @transform_11(%arg0: i32, %arg1: i32) -> (i32, i32, i32) {
    %c0_i32 = arith.constant 0 : i32
    %c0_i32_0 = arith.constant 0 : i32
    %c0_i32_1 = arith.constant 0 : i32
    return %arg1, %c0_i32, %c0_i32_0 : i32, i32, i32
  }
  func.func @transform_12(%arg0: i32, %arg1: i32) -> (i32, i32, i32) {
    %c0_i32 = arith.constant 0 : i32
    %c0_i32_0 = arith.constant 0 : i32
    %c0_i32_1 = arith.constant 0 : i32
    return %arg1, %c0_i32, %c0_i32_0 : i32, i32, i32
  }
  func.func @transform_13(%arg0: i32, %arg1: i32) -> (i32, i32, i32) {
    %c0_i32 = arith.constant 0 : i32
    %c0_i32_0 = arith.constant 0 : i32
    %c0_i32_1 = arith.constant 0 : i32
    return %arg1, %c0_i32, %c0_i32_0 : i32, i32, i32
  }
  func.func @transform_14(%arg0: i32, %arg1: i32) -> (i32, i32, i32) {
    %c0_i32 = arith.constant 0 : i32
    %c0_i32_0 = arith.constant 0 : i32
    %c0_i32_1 = arith.constant 0 : i32
    return %arg1, %c0_i32, %c0_i32_0 : i32, i32, i32
  }
  func.func @transform_15(%arg0: i32, %arg1: i32) -> (i32, i32, i32) {
    %c0_i32 = arith.constant 0 : i32
    %c0_i32_0 = arith.constant 0 : i32
    %c0_i32_1 = arith.constant 0 : i32
    return %arg0, %c0_i32, %c0_i32_0 : i32, i32, i32
  }
}

</mosaic_0001>

<bundles_post_ra>
// kernel: tpu_custom_call.1
= control target key start
LH: loop header
LB: loop body
LE: loop exit
PB: predicated region body
PF: predicated region fallthrough
CT: control target
= control target key end

     0   :  { %s3572_s0 = inlined_call_operand.hbm [shape: f32[2,8,32], index: 0, kind: input, shape index: {}]   ;;  %s3573_s1 = inlined_call_operand.hbm [shape: f32[2,8,32], index: 1, kind: input, shape index: {}]   ;;  %s3574_s2 = inlined_call_operand.vmem [shape: f32[2,1,32], index: 2, kind: input, shape index: {}]   ;;  %s3575_s3 = inlined_call_operand.vmem [shape: f32[2,1,32], index: 3, kind: input, shape index: {}]   ;;  %s3576_s4 = inlined_call_operand.vmem [shape: bf16[2,32,32], index: 4, kind: input, shape index: {}]   ;;  %s3577_s5 = inlined_call_operand.vmem [shape: bf16[2,32,32], index: 5, kind: input, shape index: {}]   ;;  %s3578_s6 = inlined_call_operand.vmem [shape: bf16[2,32,32], index: 6, kind: input, shape index: {}]   ;;  %s3579_s7 = inlined_call_operand.hbm [shape: bf16[2,4,8,32], index: 7, kind: input, shape index: {}]   ;;  %s3580_s8 = inlined_call_operand.vmem [shape: f32[2,1,32], index: 8, kind: input, shape index: {}]   ;;  %s3581_s9 = inlined_call_operand.vmem [shape: f32[2,1,32], index: 9, kind: input, shape index: {}]   ;;  %s3582_s10 = inlined_call_operand.vmem [shape: f32[2,1,32], index: 10, kind: input, shape index: {}]   ;;  %s3583_s11 = inlined_call_operand.hbm [shape: bf16[2,32,64], index: 11, kind: input, shape index: {}]   ;;  %s3584_s12 = inlined_call_operand.vmem [shape: f32[2,1,64], index: 12, kind: input, shape index: {}]   ;;  %s3585_s13 = inlined_call_operand.vmem [shape: bf16[2,64,32], index: 13, kind: input, shape index: {}]   ;;  %s3586_s14 = inlined_call_operand.vmem [shape: f32[2,1,32], index: 14, kind: input, shape index: {}]   ;;  %s3587_s15 = inlined_call_operand.hbm [shape: f32[2,8,32], index: 15, kind: output, shape index: {}]  }
   0x1   :  { %3610 = sst [smem:[#allocation33_spill]] %s3572_s0 }
   0x2   :  { %3611 = sst [smem:[#allocation34_spill]] %s3573_s1 }
   0x3   :  { %3612 = sst [smem:[#allocation35_spill]] %s3576_s4 }
   0x4   :  { %3613 = sst [smem:[#allocation36_spill]] %s3577_s5 }
   0x5   :  { %3614 = sst [smem:[#allocation37_spill]] %s3578_s6 }
   0x6   :  { %3615 = sst [smem:[#allocation38_spill]] %s3579_s7 }
   0x7   :  { %3616 = sst [smem:[#allocation39_spill]] %s3580_s8 }
   0x8   :  { %3617 = sst [smem:[#allocation40_spill]] %s3581_s9 }
   0x9   :  { %3618 = sst [smem:[#allocation41_spill]] %s3582_s10 }
   0xa   :  { %3619 = sst [smem:[#allocation42_spill]] %s3583_s11 }
   0xb   :  { %3620 = sst [smem:[#allocation43_spill]] %s3584_s12 }
   0xc   :  { %3621 = sst [smem:[#allocation44_spill]] %s3585_s13 }
   0xd   :  { %3622 = sst [smem:[#allocation45_spill]] %s3586_s14 }
   0xe   :  { %3623 = sst [smem:[#allocation46_spill]] %s3587_s15 }
   0xf   :  { %20 = vsyncpa [#allocation4], 0 }
  0x10   :  { %22 = vsyncpa [#allocation4 + $0x1], 0 }
  0x11   :  { %23 = vsyncpa [#allocation7], 0 }
  0x12   :  { %25 = vsyncpa [#allocation7 + $0x1], 0 }
  0x13   :  { %26 = vsyncpa [#allocation10], 0 }
  0x14   :  { %28 = vsyncpa [#allocation10 + $0x1], 0 }
  0x15   :  { %29 = vsyncpa [#allocation5], 0 }
  0x16   :  { %31 = vsyncpa [#allocation5 + $0x1], 0  ;;  %s2898_s18 = smov 0   ;;  %s2900_s19 = smov 0  }
  0x17   :  { %s2902_s20 = smov 0   ;;  %s2904_s21 = smov 0  }
  0x18   :  { %s2906_s22 = smov 0   ;;  %s2908_s23 = smov 0  }
  0x19   :  { %s2910_s24 = smov 0   ;;  %s2912_s25 = smov 0  }
  0x1a   :  { %s2914_s26 = smov 0   ;;  %s2916_s27 = smov 0  }
  0x1b   :  { %s2918_s28 = smov 0  }
  0x1c LB: > { %3624 = sst [smem:[#allocation17_spill]] %s2768_s19  ;;  %s2954_s29 = sadd.s32 4294967295, %s2804_s28   ;;  %s2804_s28 = sphi %s2918_s28, %s37_s28   ;;  %s2800_s27 = sphi %s2916_s27, %s3698_s27   ;;  %s2796_s26 = sphi %s2914_s26, %s3697_s26   ;;  %s2792_s25 = sphi %s2912_s25, %s3696_s25   ;;  %s2788_s24 = sphi %s2910_s24, %s3695_s24   ;;  %s2784_s23 = sphi %s2908_s23, %s3694_s23   ;;  %s2780_s22 = sphi %s2906_s22, %s3693_s22   ;;  %s2776_s21 = sphi %s2904_s21, %s3692_s21   ;;  %s2772_s20 = sphi %s2902_s20, %s3691_s20   ;;  %s2768_s19 = sphi %s2900_s19, %s3690_s19   ;;  %s2764_s18 = sphi %s2898_s18, %s3689_s18  }
  0x1d   : > { %3625 = sst [smem:[#allocation18_spill]] %s2772_s20  ;;  %s2156_s30 = sadd.s32 4294967294, %s2804_s28  }
  0x1e   : > { %3626 = sst [smem:[#allocation19_spill]] %s2776_s21  ;;  %s46_s16 = sadd.s32 1, %s2796_s26 }
  0x1f   : > { %3627 = sst [smem:[#allocation20_spill]] %s2780_s22  ;;  %s49_s17 = sadd.s32 1, %s2800_s27 }
  0x20   : > { %3628 = sst [smem:[#allocation21_spill]] %s2784_s23  ;;  %p47_p0 = scmp.ge.s32.totalorder %s46_s16, 2 }
  0x21   : > { %3629 = sst [smem:[#allocation22_spill]] %s2792_s25  ;;  %s56_s15 = sadd.s32 1, %s2784_s23 }
  0x22   : > { %3630 = sst [smem:[#allocation23_spill]] %s2796_s26  ;;  %p63_p1 = scmp.ne.s32.totalorder %s2784_s23, %s2780_s22 }
  0x23   : > { %3631 = sst [smem:[#allocation24_spill]] %s2800_s27  ;;  %p64_p2 = scmp.eq.s32.totalorder %s2804_s28, 0 }
  0x24   : > { %3632 = sst [smem:[#allocation25_spill]] %s2804_s28  ;;  %s3700_s16 = smov (%p47_p0, %s46_s16), 0 }
  0x25   : > { %3633 = sst [smem:[#allocation26_spill]] %s3700_s16  ;;  %s3702_s17 = smov (!%p47_p0, %s49_s17), %s2800_s27 }
  0x26   : > { %p2971_p3 = por %p64_p2, %p63_p1  ;;  %p3590_p4 = scmp.ne.s32.totalorder %s2780_s22, %s2776_s21 }
  0x27   : > { %p51_p5 = scmp.ge.s32.totalorder %s3702_s17, 2  ;;  %p70_p6 = scmp.eq.s32.totalorder %s2954_s29, 0 }
  0x28   : > { %s235_s13 = ssub.s32 %s2796_s26, %s3700_s16  ;;  %s238_s14 = sadd.s32 1, %s2772_s20 }
  0x29   : > { %s3704_s17 = smov (%p51_p5, %s3702_s17), 0  ;;  %p2988_p7 = por %p70_p6, %p3590_p4 }
  0x2a   : > { %3635 = sst [smem:[#allocation27_spill]] %s3704_s17  ;;  %p236_p8 = scmp.eq.s32.totalorder %s235_s13, 0 }
  0x2b   : > { %s3636_s12 = scalar_select %p2988_p7, 1, 0 }
  0x2c   : > { %s53_s10 = ssub.s32 %s2800_s27, %s3704_s17  ;;  %p245_p9 = scmp.ne.s32.totalorder %s2772_s20, %s2768_s19 }
  0x2d   : > { %p54_p10 = scmp.eq.s32.totalorder %s53_s10, 0  ;;  %p251_p11 = scmp.ne.s32.totalorder %s2768_s19, %s2764_s18 }
  0x2e   : > { %s2999_s16 = scalar_select %p236_p8, %s2772_s20, %s238_s14  }
  0x2f   : > { %s3002_s9 = scalar_select %p54_p10, %s2784_s23, %s56_s15  }
  0x30   : > { %3637 = sst [smem:[#allocation28_spill]] %s2999_s16  ;;  %p3006_p12 = por %p245_p9, %p64_p2 }
  0x31   : > { %3638 = sst [smem:[#allocation29_spill]] %s3002_s9  ;;  %p3012_p13 = por %p251_p11, %p70_p6 }
  0x32   : > { %p457_p0 = scmp.eq.s32.totalorder %s2954_s29, 3  ;;  %p463_p5 = scmp.eq.s32.totalorder %s2156_s30, 3 }
  0x33   : > { %s3640_s13 = scalar_select %p3012_p13, 1, 0 }
  0x34   : > { %p2417_p4 = scmp.lt.s32.totalorder %s2804_s28, 4  ;;  %p3021_p7 = por %p457_p0, %p63_p1 }
  0x35   : > { %p3643_p8 = scmp.ne.s32.totalorder %s2780_s22, %s2776_s21  ;;  %s3596_s15 = sand.u32 1, %s2784_s23  }
  0x36   : > { %s3641_s10 = scalar_select %p3021_p7, 1, 0 }
  0x37   : > { %p3028_p10 = por %p463_p5, %p3643_p8  ;;  %s3598_s18 = sshll.u32 %s2800_s27, 7 }
  0x38   : > { %3642 = sst [smem:[#allocation30_spill]] %s3641_s10  ;;  %s3036_s17 = sshll.u32 %s3596_s15, 3 }
  0x39   : > { %s3644_s14 = scalar_select %p3028_p10, 1, 0 }
  0x3a   : > { %p3040_p2 = pnand %p2417_p4, %p2971_p3  ;;  %s501_s9 = sand.u32 1, %s2804_s28  }
  0x3b   : > { %3645 = sst [smem:[#allocation31_spill]] %s3644_s14  ;;  %s3647_s1 = sld [smem:[#allocation34_spill]] }
  0x3c   : > { %s505_s15 = scalar_lea.vmem [#allocation6], %s3036_s17  ;;  %p3057_p1 = pnand %p2417_p4, %p3006_p12 }
  0x3d   : > { %s512_s25 = sshll.u32 %s505_s15, 4  ;;  %s3061_s5 = scalar_lea.sflag [#allocation7], %s501_s9  ;;  %s3053_s25 = int_to_ptr.vmem [resolvable:$true] %s512_s25 }
  0x3e   : > { %p2552_p6 = pneg %p3040_p2 }
  0x41   : > { %s3050_s10 = scalar_lea.hbm %s3647_s1, %s3598_s18  ;;  %s2555_s15 = scalar_lea.hbm %s3647_s1, 256 }
  0x42   : > { %s2550_s4 = scalar_lea.hbm %s3050_s10, 128  ;;  %p2556_p4 = scmp.lt.u32.totalorder %s3050_s10, %s3647_s1 }
  0x43   : > { %p2551_p3 = scmp.ne.s32.totalorder %s3050_s10, %s2550_s4  ;;  %p2557_p12 = scmp.lt.u32.totalorder %s2555_s15, %s2550_s4 }
  0x44   : > { %p2559_p5 = scmp.lt.u32.totalorder %s2550_s4, %s3050_s10 }
  0x45   : > { %p2553_p9 = pnand %p2552_p6, %p2551_p3  ;;  %p2558_p0 = por %p2557_p12, %p2556_p4 }
  0x47   : > { %p2554_p11 = pneg %p2553_p9  ;;  %p2560_p8 = por %p2559_p5, %p2558_p0 }
  0x49   : > { %p2561_p10 = pnand %p2560_p8, %p2554_p11 }
  0x4b   : > { %2564 = shalt.err (!%p2561_p10)
}
  0x4c   : > { %s2565_s9 = scalar_lea.vmem %s3053_s25, 128  ;;  %s2806_s21 = smov [#allocation6]  }
  0x4d   : > { %p2566_p3 = scmp.ne.s32.totalorder %s3053_s25, %s2565_s9  ;;  %s2570_s16 = sshll.u32 %s2806_s21, 4  ;;  %s2571_s16 = int_to_ptr.vmem [resolvable:$false] %s2570_s16 }
  0x4e   : > { %s2572_s18 = scalar_lea.vmem %s2571_s16, 256  ;;  %p2573_p13 = scmp.lt.s32.totalorder %s3053_s25, %s2571_s16 }
  0x4f   : > { %p2568_p9 = pnand %p2566_p3, %p2552_p6  ;;  %p2574_p4 = scmp.lt.s32.totalorder %s2572_s18, %s2565_s9 }
  0x51   : > { %p2569_p7 = pneg %p2568_p9  ;;  %p2575_p12 = por %p2574_p4, %p2573_p13 }
  0x53   : > { %p2576_p0 = pnand %p2575_p12, %p2569_p7 }
  0x55   : > { %2579 = shalt.err (!%p2576_p0)
}
  0x56   : > { %2406 = dma.hbm_to_vmem [thread:$0]  (!%p3040_p2), %s3050_s10, 128, %s3053_s25, %s3061_s5  }
  0x57   : > { %p2169_p10 = scmp.ge.s32.totalorder %s2804_s28, 1  ;;  %p633_p11 = scmp.lt.s32.totalorder %s2804_s28, 5 }
  0x58   : > { %s3650_s15 = sshll.u32 %s2800_s27, 7  ;;  %s3651_s0 = sld [smem:[#allocation33_spill]] }
  0x59   : > { %p3091_p5 = pnand %p2169_p10, %p633_p11  ;;  %s487_s16 = scalar_lea.vmem [#allocation3], %s3036_s17 }
  0x5a   : > { %s494_s18 = sshll.u32 %s487_s16, 4  ;;  %s557_s10 = sand.u32 1, %s2772_s20   ;;  %s3103_s18 = int_to_ptr.vmem [resolvable:$true] %s494_s18 }
  0x5b   : > { %s3649_s4 = scalar_select %p3091_p5, 1, 0 }
  0x5c   : > { %s3652_s25 = sand.u32 1, %s2784_s23  }
  0x5d   : > { %s484_s1 = scalar_lea.sflag [#allocation4], %s3652_s25 }
  0x5e   : > { %s3100_s21 = scalar_lea.hbm %s3651_s0, %s3650_s15  ;;  %s2585_s9 = scalar_lea.hbm %s3651_s0, 256 }
  0x5f   : > { %s2580_s28 = scalar_lea.hbm %s3100_s21, 128  ;;  %p2586_p3 = scmp.lt.u32.totalorder %s3100_s21, %s3651_s0 }
  0x60   : > { %p2581_p7 = scmp.ne.s32.totalorder %s3100_s21, %s2580_s28  ;;  %p2587_p9 = scmp.lt.u32.totalorder %s2585_s9, %s2580_s28 }
  0x61   : > { %p2589_p12 = scmp.lt.u32.totalorder %s2580_s28, %s3100_s21 }
  0x62   : > { %p2583_p13 = pnand %p2581_p7, %p2552_p6  ;;  %p2588_p4 = por %p2587_p9, %p2586_p3 }
  0x64   : > { %p2584_p8 = pneg %p2583_p13  ;;  %p2590_p0 = por %p2589_p12, %p2588_p4 }
  0x66   : > { %p2591_p10 = pnand %p2590_p0, %p2584_p8 }
  0x68   : > { %2594 = shalt.err (!%p2591_p10)
}
  0x69   : > { %s2595_s17 = scalar_lea.vmem %s3103_s18, 128  ;;  %s2807_s16 = smov [#allocation3]  }
  0x6a   : > { %p2596_p11 = scmp.ne.s32.totalorder %s3103_s18, %s2595_s17  ;;  %s2600_s25 = sshll.u32 %s2807_s16, 4  ;;  %s2601_s25 = int_to_ptr.vmem [resolvable:$false] %s2600_s25 }
  0x6b   : > { %s2602_s8 = scalar_lea.vmem %s2601_s25, 256  ;;  %p2603_p5 = scmp.lt.s32.totalorder %s3103_s18, %s2601_s25 }
  0x6c   : > { %p2598_p7 = pnand %p2596_p11, %p2552_p6  ;;  %p2604_p3 = scmp.lt.s32.totalorder %s2602_s8, %s2595_s17 }
  0x6e   : > { %p2599_p13 = pneg %p2598_p7  ;;  %p2605_p9 = por %p2604_p3, %p2603_p5 }
  0x70   : > { %p2606_p4 = pnand %p2605_p9, %p2599_p13 }
  0x72   : > { %2609 = shalt.err (!%p2606_p4)
}
  0x73   : > { %2403 = dma.hbm_to_vmem [thread:$0]  (!%p3040_p2), %s3100_s21, 128, %s3103_s18, %s484_s1  }
  0x74   : > { %s3133_s27 = sshll.u32 %s557_s10, 4  ;;  %s2227_s28 = sshll.u32 %s2796_s26, 8 }
  0x75   : > { %s3653_s7 = sld [smem:[#allocation38_spill]]  ;;  %s559_s30 = scalar_lea.vmem [#allocation8], %s3133_s27 }
  0x76   : > { %s566_s17 = sshll.u32 %s559_s30, 4  ;;  %p2612_p6 = pneg %p3057_p1  ;;  %s3144_s17 = int_to_ptr.vmem [resolvable:$true] %s566_s17 }
  0x7b   : > { %s3141_s9 = scalar_lea.hbm %s3653_s7, %s2227_s28  ;;  %s2615_s16 = scalar_lea.hbm %s3653_s7, 512 }
  0x7c   : > { %s2610_s1 = scalar_lea.hbm %s3141_s9, 256  ;;  %p2616_p12 = scmp.lt.u32.totalorder %s3141_s9, %s3653_s7 }
  0x7d   : > { %p2611_p2 = scmp.ne.s32.totalorder %s3141_s9, %s2610_s1  ;;  %p2617_p0 = scmp.lt.u32.totalorder %s2615_s16, %s2610_s1 }
  0x7e   : > { %p2619_p11 = scmp.lt.u32.totalorder %s2610_s1, %s3141_s9 }
  0x7f   : > { %p2613_p5 = pnand %p2612_p6, %p2611_p2  ;;  %p2618_p10 = por %p2617_p0, %p2616_p12 }
  0x81   : > { %p2614_p8 = pneg %p2613_p5  ;;  %p2620_p7 = por %p2619_p11, %p2618_p10 }
  0x83   : > { %p2621_p13 = pnand %p2620_p7, %p2614_p8 }
  0x85   : > { %2624 = shalt.err (!%p2621_p13)
}
  0x86   : > { %s2625_s6 = scalar_lea.vmem %s3144_s17, 256  ;;  %s2808_s15 = smov [#allocation8]  }
  0x87   : > { %p2626_p3 = scmp.ne.s32.totalorder %s3144_s17, %s2625_s6  ;;  %s2630_s30 = sshll.u32 %s2808_s15, 4  ;;  %s2631_s30 = int_to_ptr.vmem [resolvable:$false] %s2630_s30 }
  0x88   : > { %s2632_s21 = scalar_lea.vmem %s2631_s30, 512  ;;  %p2633_p2 = scmp.lt.s32.totalorder %s3144_s17, %s2631_s30 }
  0x89   : > { %p2628_p9 = pnand %p2626_p3, %p2612_p6  ;;  %p2634_p5 = scmp.lt.s32.totalorder %s2632_s21, %s2625_s6 }
  0x8b   : > { %p2629_p4 = pneg %p2628_p9  ;;  %p2635_p12 = por %p2634_p5, %p2633_p2 }
  0x8d   : > { %p2636_p0 = pnand %p2635_p12, %p2629_p4 }
  0x8f   : > { %2639 = shalt.err (!%p2636_p0)
}
  0x90   : > { %s2809_s1 = smov 64   ;;  %s2810_s18 = smov 4  }
  0x91   : > { %2409 = dma.hbm_to_vmem [thread:$0]  (!%p3057_p1), %s3141_s9, 256, %s3144_s17, %s3061_s5, %s2809_s1, %s2809_s1, %s2810_s18  }
  0x92   : > { %s3654_s11 = sld [smem:[#allocation42_spill]]  ;;  %s598_s6 = scalar_lea.vmem [#allocation9], %s3133_s27 }
  0x93   : > { %s605_s15 = sshll.u32 %s598_s6, 4  ;;  %s3187_s30 = scalar_lea.sflag [#allocation10], %s557_s10  ;;  %s3183_s15 = int_to_ptr.vmem [resolvable:$true] %s605_s15 }
  0x98   : > { %s3180_s8 = scalar_lea.hbm %s3654_s11, %s2227_s28  ;;  %s2645_s9 = scalar_lea.hbm %s3654_s11, 512 }
  0x99   : > { %s2640_s21 = scalar_lea.hbm %s3180_s8, 256  ;;  %p2646_p7 = scmp.lt.u32.totalorder %s3180_s8, %s3654_s11 }
  0x9a   : > { %p2641_p8 = scmp.ne.s32.totalorder %s3180_s8, %s2640_s21  ;;  %p2647_p13 = scmp.lt.u32.totalorder %s2645_s9, %s2640_s21 }
  0x9b   : > { %p2649_p9 = scmp.lt.u32.totalorder %s2640_s21, %s3180_s8 }
  0x9c   : > { %p2643_p10 = pnand %p2641_p8, %p2612_p6  ;;  %p2648_p3 = por %p2647_p13, %p2646_p7 }
  0x9e   : > { %p2644_p11 = pneg %p2643_p10  ;;  %p2650_p4 = por %p2649_p9, %p2648_p3 }
  0xa0   : > { %p2651_p2 = pnand %p2650_p4, %p2644_p11 }
  0xa2   : > { %2654 = shalt.err (!%p2651_p2)
}
  0xa3   : > { %s2655_s10 = scalar_lea.vmem %s3183_s15, 256  ;;  %s2811_s27 = smov [#allocation9]  }
  0xa4   : > { %p2656_p5 = scmp.ne.s32.totalorder %s3183_s15, %s2655_s10  ;;  %s2660_s25 = sshll.u32 %s2811_s27, 4  ;;  %s2661_s25 = int_to_ptr.vmem [resolvable:$false] %s2660_s25 }
  0xa5   : > { %s2662_s6 = scalar_lea.vmem %s2661_s25, 512  ;;  %p2663_p8 = scmp.lt.s32.totalorder %s3183_s15, %s2661_s25 }
  0xa6   : > { %p2658_p12 = pnand %p2656_p5, %p2612_p6  ;;  %p2664_p10 = scmp.lt.s32.totalorder %s2662_s6, %s2655_s10 }
  0xa8   : > { %p2659_p0 = pneg %p2658_p12  ;;  %p2665_p7 = por %p2664_p10, %p2663_p8 }
  0xaa   : > { %p2666_p13 = pnand %p2665_p7, %p2659_p0 }
  0xac   : > { %2669 = shalt.err (!%p2666_p13)
}
  0xad   : > { %2412 = dma.hbm_to_vmem [thread:$0]  (!%p3057_p1), %s3180_s8, 256, %s3183_s15, %s3187_s30, %s2809_s1, %s2809_s1, %s2810_s18  }
  0xae   : > { %p3655_p6 = scmp.ne.s32.totalorder %s3649_s4, 0 }
  0xb0   : > { %637 = sbr.rel (%p3655_p6) target bundleno = 3901 (0xf3d), region = 80 }
  0xb7   : > { %s3219_s21 = sand.u32 1, %s2780_s22   ;;  %p3657_p11 = scmp.ne.s32.totalorder %s3636_s12, 0 }
  0xb8   : > { %3656 = sst [smem:[#allocation32_spill]] %s3219_s21  ;;  %s3222_s5 = sshll.u32 %s3219_s21, 3 }
  0xb9   : > { %s640_s14 = scalar_lea.sflag [#allocation4], %s3219_s21 }
  0xba   : > { %2743 = dma.done.wait (%p3657_p11), %s640_s14, 128  }
  0xbb   : > { %2745 = vsyncadd (%p3657_p11), %s640_s14, 4294967168  ;;  %s648_s4 = sand.u32 1, %s2954_s29  }
  0xbc   : > { %s649_s1 = scalar_lea.sflag [#allocation7], %s648_s4 }
  0xbd   : > { %2747 = dma.done.wait (%p3657_p11), %s649_s1, 128  }
  0xbe   : > { %2749 = vsyncadd (%p3657_p11), %s649_s1, 4294967168  ;;  %s659_s8 = sand.u32 1, %s2768_s19   ;;  %p3658_p1 = scmp.ne.s32.totalorder %s3640_s13, 0 }
  0xbf   : > { %s3237_s15 = sshll.u32 %s659_s8, 4 }
  0xc0   : > { %s3240_s30 = scalar_lea.vmem [#allocation8], %s3237_s15 }
  0xc1   : > { %2751 = dma.done.wait (%p3658_p1), %s649_s1, 256  }
  0xc2   : > { %2753 = vsyncadd (%p3658_p1), %s649_s1, 4294967040  ;;  %s667_s29 = scalar_lea.sflag [#allocation10], %s659_s8 }
  0xc3   : > { %2755 = dma.done.wait (%p3658_p1), %s667_s29, 256  }
  0xc4   : > { %2757 = vsyncadd (%p3658_p1), %s667_s29, 4294967040  ;;  %p773_p3 = scmp.lt.s32.totalorder %s2788_s24, 1  ;;  %s3660_s16 = sld [smem:[#allocation35_spill]] }
  0xc5   : > { %s3661_s0 = sld [smem:[#allocation36_spill]]  ;;  %s3662_s26 = sld [smem:[#allocation37_spill]] }
  0xc6   : > { %s3253_s12 = scalar_select %p773_p3, %s2788_s24, 1 }
  0xc7   : > { %s3663_s23 = sld [smem:[#allocation40_spill]]  ;;  %s3664_s8 = sld [smem:[#allocation41_spill]] }
  0xc8   : > { %s2229_s6 = sshll.u32 %s3253_s12, 4  ;;  %s3665_s22 = sld [smem:[#allocation43_spill]] }
  0xc9   : > { %s2232_s28 = sshll.u32 %s3253_s12, 5  ;;  %s3666_s19 = sld [smem:[#allocation45_spill]] }
  0xca   : > { %s3271_s9 = scalar_lea.vmem %s3660_s16, %s2229_s6  ;;  %s3667_s13 = sld [smem:[#allocation44_spill]] }
  0xcb   : > { %s3276_s7 = scalar_lea.vmem %s3661_s0, %s2229_s6  ;;  %s3281_s10 = scalar_lea.vmem %s3662_s26, %s2229_s6 }
  0xcc   : > { %s772_s25 = scalar_lea.vmem [#allocation11], %s3222_s5  ;;  %p2183_p9 = scmp.ne.s32.totalorder %s2788_s24, 0 }
  0xcd   : > { %s799_s14 = scalar_lea.vmem %s3663_s23, %s3253_s12  ;;  %s802_s29 = scalar_lea.vmem %s3664_s8, %s3253_s12  ;;  %vm820_vm0 = vcmask (!%p2183_p9), 261120  }
  0xce   : > { %s805_s20 = scalar_lea.vmem %s3665_s22, %s3253_s12  ;;  %818 = sbr.rel (%p2183_p9) target bundleno = 213 (0xd5), region = 100 }
  0xcf   : > { %s813_s21 = scalar_lea.vmem %s3666_s19, %s3253_s12  ;;  %s3668_s23 = scalar_lea.vmem (!%p2183_p9), [#allocation3], %s3222_s5 }
  0xd0   : > { %s3303_s6 = scalar_lea.vmem %s3667_s13, %s2232_s28  ;;  %v819_v0 = vld [vmem:[%s3668_s23] sm:$0xff] (!%p2183_p9) }
  0xd1   : > { %821 = vst.msk [vmem:[#allocation2] sm:$0xff] (!%p2183_p9), %vm820_vm0, %v819_v0 }
  0xd5 PF: > { %vm826_vm1 = vcmask 261120   ;;  %s3669_s19 = scalar_lea.vmem [#allocation6], %s3222_s5  ;;  %v2514_v15 = vld [vmem:[%s3271_s9] sm:$0xff]   ;;  %v2812_v17 = vmov 0.0   ;;  %v2515_v18 = vld [vmem:[%s3271_s9 + $0x8] sm:$0xff]   ;;  %vm2813_vm2 = vmmov 0   ;;  %s3670_s9 = scalar_lea.vmem %s3574_s2, %s3253_s12 }
  0xd6   : > { %v823_v2 = vld [vmem:[%s3669_s19] sm:$0xff]  ;;  %2274 = vmatprep.subr.bf16.mxu1 %v2812_v17  ;;  %2290 = vmatprep.subr.bf16.mxu0 %v2812_v17  ;;  %v2518_v19 = vld [vmem:[%s3281_s10 + $0x8] sm:$0xff]   ;;  %s3671_s27 = scalar_lea.vmem %s3575_s3, %s3253_s12  ;;  %vm1112_vm3 = vcmask 1043456   ;;  %vm1050_vm4 = vcmask 64512   ;;  %s2815_s4 = smov 112   ;;  %vm1836_vm5 = vcmask 523264  }
  0xd7   : > { %v856_v4 = vsel %vm826_vm1, %v823_v2, 0.0  ;;  %v2516_v16 = vld [vmem:[%s3281_s10] sm:$0xff]   ;;  %2275 = vmatpush3.bf16.msra.mxu1 %v2514_v15  ;;  %2278 = vmatprep.mubr.msk.bf16.mxu1 %vm2813_vm2, %v2812_v17  ;;  %v2519_v38 = vld [vmem:[%s3276_s7 + $0x8] sm:$0xff]   ;;  %s2816_s1 = smov 104   ;;  %s3672_s16 = sld [smem:[#allocation39_spill]] }
  0xd8   : > { %v3309_v1 = vld [vmem:[#allocation2] sm:$0xff]  ;;  %2291 = vmatpush3.bf16.msra.mxu0 %v2516_v16  ;;  %2276 = vmatprep.subr.bf16.mxu1 %v2812_v17  ;;  %s3674_s0 = scalar_lea.vmem [#allocation9], %s3237_s15  ;;  %s3679_s24 = sld [smem:[#allocation22_spill]] }
  0xd9   : > { %v827_v3 = vsel %vm826_vm1, %v3309_v1, 0.0  ;;  %2292 = vmatprep.subr.bf16.mxu0 %v2812_v17  ;;  %2294 = vmatprep.mubr.msk.bf16.mxu0 %vm2813_vm2, %v2812_v17  ;;  %v2184_v27 = vld [vmem:[%s3670_s9] ss:$0 sm:$0xff]  ;;  %s3675_s18 = smov %s3674_s0  ;;  %s3682_s10 = sld [smem:[#allocation30_spill]] }
  0xda   : > { %828 = vadd.xlane.f32.xlu0 %v827_v3  ;;  %v2185_v29 = vld [vmem:[%s3671_s27] ss:$0 sm:$0xff] }
  0xdb   : > { %2277 = vmatpush3.bf16.msra.mxu1 %v2515_v18  ;;  %v2517_v34 = vld [vmem:[%s3276_s7] sm:$0xff]   ;;  %s2814_s7 = smov 120  }
  0xdc   : > { %2282 = vmatprep.subr.bf16.mxu1 %v2812_v17  ;;  %2293 = vmatpush3.bf16.msra.mxu0 %v2518_v19 }
  0xdd   : > { %2304 = vmatprep.subr.bf16.mxu0 %v2812_v17  ;;  %s3673_s28 = scalar_lea.vmem %s3672_s16, %s3253_s12  ;;  %s2817_s16 = smov [#allocation11]  }
  0xde   : > { %857 = vadd.xlane.f32.xlu0 %v856_v4  ;;  %s2224_s27 = sshll.u32 %s3679_s24, 7 }
  0xdf   : > { %p3684_p2 = scmp.ne.s32.totalorder %s3682_s10, 0 }
 0x167   : > { %v829_v5 = vpop.xlane.xlu0 %828 }
 0x168   : > { %v831_v6 = vmul.f32 0.03125, %v829_v5 }
 0x16a   : > { %v832_v7 = vsub.f32 %v3309_v1, %v831_v6 }
 0x16b   : > { %v858_v8 = vpop.xlane.xlu0 %857 }
 0x16c   : > { %v859_v9 = vmul.f32 0.03125, %v858_v8  ;;  %v833_v10 = vmul.f32 %v832_v7, %v832_v7 }
 0x16e   : > { %v860_v11 = vsub.f32 %v823_v2, %v859_v9  ;;  %v834_v12 = vsel %vm826_vm1, %v833_v10, 0.0 }
 0x16f   : > { %835 = vadd.xlane.f32.xlu1 %v834_v12 }
 0x170   : > { %v861_v13 = vmul.f32 %v860_v11, %v860_v11 }
 0x172   : > { %v862_v14 = vsel %vm826_vm1, %v861_v13, 0.0 }
 0x173   : > { %863 = vadd.xlane.f32.xlu1 %v862_v14 }
 0x1fc   : > { %v836_v20 = vpop.xlane.xlu1 %835 }
 0x1fd   : > { %v837_v21 = vmul.f32 0.03125, %v836_v20 }
 0x1ff   : > { %v838_v22 = vadd.f32 1e-05, %v837_v21 }
 0x200   : > { %v864_v23 = vpop.xlane.xlu1 %863 }
 0x201   : > { %2526 = vrsqrt.f32 %v838_v22  ;;  %v865_v24 = vmul.f32 0.03125, %v864_v23 }
 0x203   : > { %v866_v25 = vadd.f32 1e-05, %v865_v24 }
 0x205   : > { %2528 = vrsqrt.f32 %v866_v25  ;;  %v2199_v25 = vld [vmem:[%s3240_s30 + $0x4] sm:$0xf] }
 0x20b   : > { %v2527_v26 = vpop.eup %2526 }
 0x20c   : > { %v840_v28 = vmul.f32 %v2527_v26, %v832_v7  ;;  %v1278_v26 = vsel %vm1112_vm3, %v2199_v25, 0 }
 0x20e   : > { %v847_v30 = vmul.f32 %v2184_v27, %v840_v28 }
 0x20f   : > { %v2529_v31 = vpop.eup %2528 }
 0x210   : > { %v854_v32 = vadd.f32 %v2185_v29, %v847_v30  ;;  %v868_v33 = vmul.f32 %v2529_v31, %v860_v11 }
 0x212   : > { %v855_v35 = vpack.c.bf16 %v854_v32, %v854_v32  ;;  %v869_v36 = vmul.f32 %v2184_v27, %v868_v33 }
 0x214   : > { %2279 = vmatmul.mubr.msk.bf16.vlgmr.msra.gmra.mrb[0].mxu1 %vm826_vm1, %v855_v35  ;;  %v870_v37 = vadd.f32 %v2185_v29, %v869_v36  ;;  %v1157_v29 = vld [vmem:[%s3240_s30] sm:$0xf] }
 0x215   : > { %2283 = vmatpush3.bf16.msra.mxu1 %v2517_v34  ;;  %2286 = vmatprep.mubr.msk.bf16.mxu1 %vm2813_vm2, %v2812_v17  ;;  %v1324_v32 = vsel %vm1112_vm3, %v1157_v29, 0 }
 0x216   : > { %2284 = vmatprep.subr.bf16.mxu1 %v2812_v17  ;;  %v871_v39 = vpack.c.bf16 %v870_v37, %v870_v37 }
 0x218   : > { %2295 = vmatmul.mubr.msk.bf16.vlgmr.msra.gmra.mrb[0].mxu0 %vm826_vm1, %v871_v39 }
 0x219   : > { %2285 = vmatpush3.bf16.msra.mxu1 %v2519_v38  ;;  %2306 = vmatprep.mubr.msk.bf16.mxu0 %vm2813_vm2, %v2812_v17 }
 0x21a   : > { %2298 = vmatprep.subr.bf16.mxu1 %v2812_v17 }
 0x21c   : > { %2287 = vmatmul.mubr.msk.bf16.vlgmr.msra.gmra.mrb[4].mxu1 %vm826_vm1, %v871_v39 }
 0x21d   : > { %2300 = vmatprep.mubr.msk.bf16.mxu1 %vm2813_vm2, %v2812_v17 }
 0x2e7   : > { %v925_v40 = vpop.f32.mrb[0].mxu1 }
 0x2e8   : > { %v931_v41 = vmul.f32 0.17677669, %v925_v40  ;;  %v2280_v42 = vpop.f32.mrb[1].mxu1 }
 0x2e9   : > { %v928_v43 = vpop.f32.mrb[2].mxu1 }
 0x2ea   : > { %v3356_v44 = vpack.c.bf16 %v931_v41, %v931_v41  ;;  %v2281_v45 = vpop.f32.mrb[3].mxu1 }
 0x2eb   : > { %v1041_v46 = vpop.f32.mrb[0].mxu0 }
 0x2ec   : > { %v3358_v47 = vpack.c.bf16 %v1041_v46, %v1041_v46  ;;  %1159 = vrot.lane.b32.xlu1 %v3356_v44, %s2814_s7  ;;  %v2296_v48 = vpop.f32.mrb[1].mxu0 }
 0x2ed   : > { %v1044_v49 = vpop.f32.mrb[2].mxu0 }
 0x2ee   : > { %v2297_v50 = vpop.f32.mrb[3].mxu0  ;;  %v1114_v51 = vsel %vm1112_vm3, %v3358_v47, 0 }
 0x2ef   : > { %v985_v52 = vpop.f32.mrb[4].mxu1  ;;  %2305 = vmatpush3.bf16.msra.mxu0 %v1114_v51 }
 0x2f0   : > { %v3364_v53 = vpack.c.bf16 %v985_v52, %v985_v52  ;;  %v2288_v54 = vpop.f32.mrb[5].mxu1  ;;  %2316 = vmatprep.subr.bf16.mxu0 %v2812_v17 }
 0x2f1   : > { %v988_v55 = vpop.f32.mrb[6].mxu1 }
 0x2f2   : > { %1162 = vrot.lane.b32.xlu0 %v3364_v53, %s2814_s7  ;;  %v2289_v56 = vpop.f32.mrb[7].mxu1  ;;  %v1055_v57 = vsel %vm1050_vm4, %v3364_v53, 0 }
 0x2f3   : > { %2299 = vmatpush3.bf16.xpose.msra.mxu1 %v1055_v57 }
 0x2f4   : > { %2310 = vmatprep.subr.bf16.mxu1 %v2812_v17 }
 0x2fa   : > { %2301 = vmatmul.mubr.msk.bf16.vlgmr.msra.gmra.mrb[8].mxu1 %vm1050_vm4, %v3356_v44 }
 0x2fb   : > { %2312 = vmatprep.mubr.msk.bf16.mxu1 %vm2813_vm2, %v2812_v17 }
 0x35e   : > { %v1160_v60 = vpop.permute.xlu1 %1159 }
 0x364   : > { %v1163_v58 = vpop.permute.xlu0 %1162 }
 0x365   : > { %v1168_v59 = vsel %vm1050_vm4, %v1163_v58, 0 }
 0x366   : > { %2311 = vmatpush3.bf16.xpose.msra.mxu1 %v1168_v59 }
 0x367   : > { %2322 = vmatprep.subr.bf16.mxu1 %v2812_v17 }
 0x36d   : > { %2313 = vmatmul.mubr.msk.bf16.vlgmr.msra.gmra.mrb[12].mxu1 %vm1050_vm4, %v1160_v60 }
 0x36e   : > { %2324 = vmatprep.mubr.msk.bf16.mxu1 %vm2813_vm2, %v2812_v17  ;;  %2323 = vmatpush3.bf16.msra.mxu1 %v1278_v26 }
 0x36f   : > { %2334 = vmatprep.subr.bf16.mxu1 %v2812_v17 }
 0x3cd   : > { %v1091_v61 = vpop.f32.mrb[8].mxu1 }
 0x3ce   : > { %v2302_v62 = vpop.f32.mrb[9].mxu1  ;;  %v1097_v63 = vsel %vm1050_vm4, %v1091_v61, -inf }
 0x3cf   : > { %1098 = vmax.xlane.f32.xlu1 %v1097_v63  ;;  %v1094_v0 = vpop.f32.mrb[10].mxu1 }
 0x3d0   : > { %v2303_v2 = vpop.f32.mrb[11].mxu1 }
 0x440   : > { %v1204_v3 = vpop.f32.mrb[12].mxu1 }
 0x441   : > { %v2314_v4 = vpop.f32.mrb[13].mxu1  ;;  %v1210_v5 = vsel %vm1050_vm4, %v1204_v3, -inf }
 0x442   : > { %1211 = vmax.xlane.f32.xlu0 %v1210_v5  ;;  %v1207_v6 = vpop.f32.mrb[14].mxu1 }
 0x443   : > { %v2315_v7 = vpop.f32.mrb[15].mxu1 }
 0x45c   : > { %v1099_v8 = vpop.xlane.xlu1 %1098 }
 0x45d   : > { %v1100_v9 = vsub.f32 %v1091_v61, %v1099_v8 }
 0x45f   : > { %v1101_v10 = vmul.f32 1.442695, %v1100_v9 }
 0x461   : > { %2530 = vpow2.f32 %v1101_v10 }
 0x46b   : > { %v2531_v11 = vpop.eup %2530 }
 0x46c   : > { %v1103_v12 = vsel %vm1050_vm4, %v2531_v11, 0.0 }
 0x46d   : > { %1104 = vadd.xlane.f32.xlu0 %v1103_v12  ;;  %v2204_v12 = vld [vmem:[%s3240_s30 + $0x8] sm:$0xf] }
 0x483   : > { %1223 = vrot.lane.b32.xlu0 %v3358_v47, %s2814_s7  ;;  %s1897_s7 = sshll.u32 %s772_s25, 4  ;;  %s3507_s7 = int_to_ptr.vmem [resolvable:$true] %s1897_s7 }
 0x484   : > { %s2670_s12 = scalar_lea.vmem %s3507_s7, 128 }
 0x485   : > { %p2671_p4 = scmp.ne.s32.totalorder %s3507_s7, %s2670_s12 }
 0x487   : > { %p2672_p5 = pnand %p2671_p4, %p3684_p2 }
 0x489   : > { %p2673_p12 = pneg %p2672_p5 }
 0x4cf   : > { %v1212_v13 = vpop.xlane.xlu0 %1211 }
 0x4d0   : > { %v1213_v14 = vsub.f32 %v1204_v3, %v1212_v13  ;;  %v1483_v13 = vsel %vm1112_vm3, %v2204_v12, 0  ;;  %v2524_v12 = vld [vmem:[%s3303_s6 + $0x10] sm:$0xff]  }
 0x4d2   : > { %v1214_v15 = vmul.f32 1.442695, %v1213_v14 }
 0x4d4   : > { %2532 = vpow2.f32 %v1214_v15 }
 0x4de   : > { %v2533_v16 = vpop.eup %2532 }
 0x4df   : > { %v1216_v18 = vsel %vm1050_vm4, %v2533_v16, 0.0 }
 0x4e0   : > { %1217 = vadd.xlane.f32.xlu1 %v1216_v18 }
 0x4f1   : > { %1368 = vrot.lane.b32.xlu1 %v3364_v53, %s2815_s4 }
 0x4f5   : > { %1366 = vrot.lane.b32.xlu1 %v3356_v44, %s2815_s4 }
 0x4fa   : > { %v1105_v19 = vpop.xlane.xlu0 %1104 }
 0x4fb   : > { %2534 = vrcp.f32 %v1105_v19 }
 0x4fe   : > { %v1224_v22 = vpop.permute.xlu0 %1223 }
 0x4ff   : > { %v1229_v24 = vsel %vm1112_vm3, %v1224_v22, 0 }
 0x505   : > { %v2535_v20 = vpop.eup %2534 }
 0x506   : > { %v1107_v21 = vmul.f32 %v2535_v20, %v2531_v11 }
 0x508   : > { %v1108_v23 = vpack.c.bf16 %v1107_v21, %v1107_v21 }
 0x50a   : > { %2307 = vmatmul.mubr.msk.bf16.vlgmr.msra.gmra.mrb[4].mxu0 %vm1050_vm4, %v1108_v23 }
 0x50b   : > { %2317 = vmatpush3.bf16.msra.mxu0 %v1229_v24  ;;  %2318 = vmatprep.mubr.msk.bf16.mxu0 %vm2813_vm2, %v2812_v17 }
 0x50c   : > { %2328 = vmatprep.subr.bf16.mxu0 %v2812_v17 }
 0x56d   : > { %v1218_v27 = vpop.xlane.xlu1 %1217 }
 0x56e   : > { %2536 = vrcp.f32 %v1218_v27 }
 0x571   : > { %v1369_v38 = vpop.permute.xlu1 %1368 }
 0x572   : > { %v1374_v43 = vsel %vm1050_vm4, %v1369_v38, 0 }
 0x575   : > { %v1367_v46 = vpop.permute.xlu1 %1366 }
 0x578   : > { %v2537_v28 = vpop.eup %2536 }
 0x579   : > { %v1220_v30 = vmul.f32 %v2537_v28, %v2533_v16 }
 0x57b   : > { %v1221_v31 = vpack.c.bf16 %v1220_v30, %v1220_v30 }
 0x57d   : > { %2319 = vmatmul.mubr.msk.bf16.vlgmr.msra.gmra.mrb[8].mxu0 %vm1050_vm4, %v1221_v31 }
 0x57e   : > { %2329 = vmatpush3.bf16.msra.mxu0 %v1324_v32  ;;  %2330 = vmatprep.mubr.msk.bf16.mxu0 %vm2813_vm2, %v2812_v17  ;;  %v2208_v32 = vld [vmem:[%s3240_s30 + $0xc] sm:$0xf]  ;;  %s3683_s30 = sld [smem:[#allocation46_spill]] }
 0x57f   : > { %2340 = vmatprep.subr.bf16.mxu0 %v2812_v17 }
 0x584   : > { %s3505_s17 = scalar_lea.hbm %s3683_s30, %s2224_s27 }
 0x5dd   : > { %v1150_v33 = vpop.f32.mrb[4].mxu0 }
 0x5de   : > { %v1156_v34 = vpack.c.bf16 %v1150_v33, %v1150_v33  ;;  %v2308_v35 = vpop.f32.mrb[5].mxu0  ;;  %v1643_v33 = vsel %vm1112_vm3, %v2208_v32, 0 }
 0x5df   : > { %v1153_v36 = vpop.f32.mrb[6].mxu0 }
 0x5e0   : > { %v2309_v37 = vpop.f32.mrb[7].mxu0  ;;  %2331 = vmatmul.mubr.msk.bf16.vlgmr.msra.gmra.mrb[12].mxu0 %vm1050_vm4, %v1156_v34 }
 0x5e1   : > { %2342 = vmatprep.mubr.msk.bf16.mxu0 %vm2813_vm2, %v2812_v17 }
 0x650   : > { %v1265_v39 = vpop.f32.mrb[8].mxu0 }
 0x651   : > { %v1271_v40 = vpack.c.bf16 %v1265_v39, %v1265_v39  ;;  %v2320_v41 = vpop.f32.mrb[9].mxu0 }
 0x652   : > { %v1268_v42 = vpop.f32.mrb[10].mxu0 }
 0x653   : > { %v2321_v45 = vpop.f32.mrb[11].mxu0  ;;  %2325 = vmatmul.mubr.msk.bf16.vlgmr.msra.gmra.mrb[16].mxu1 %vm1050_vm4, %v1271_v40 }
 0x654   : > { %2335 = vmatpush3.bf16.xpose.msra.mxu1 %v1374_v43  ;;  %2336 = vmatprep.mubr.msk.bf16.mxu1 %vm2813_vm2, %v2812_v17 }
 0x655   : > { %2346 = vmatprep.subr.bf16.mxu1 %v2812_v17 }
 0x65b   : > { %2337 = vmatmul.mubr.msk.bf16.vlgmr.msra.gmra.mrb[20].mxu1 %vm1050_vm4, %v1367_v46 }
 0x65c   : > { %2348 = vmatprep.mubr.msk.bf16.mxu1 %vm2813_vm2, %v2812_v17  ;;  %2347 = vmatpush3.bf16.msra.mxu1 %v1483_v13  ;;  %v2525_v13 = vld [vmem:[%s3303_s6 + $0x18] sm:$0xff]  }
 0x65d   : > { %2358 = vmatprep.subr.bf16.mxu1 %v2812_v17 }
 0x6b3   : > { %v1360_v48 = vpop.f32.mrb[12].mxu0 }
 0x6b4   : > { %v2332_v49 = vpop.f32.mrb[13].mxu0 }
 0x6b5   : > { %v1363_v50 = vpop.f32.mrb[14].mxu0 }
 0x6b6   : > { %v2333_v51 = vpop.f32.mrb[15].mxu0 }
 0x726   : > { %v1314_v52 = vpop.f32.mrb[16].mxu1 }
 0x727   : > { %v3416_v54 = vadd.f32 %v1360_v48, %v1314_v52  ;;  %v2326_v55 = vpop.f32.mrb[17].mxu1  ;;  %v2210_v52 = vld [vmem:[%s3673_s28] ss:$0 sm:$0xff]  ;;  %s2674_s28 = sshll.u32 %s2817_s16, 4  ;;  %s2675_s28 = int_to_ptr.vmem [resolvable:$false] %s2674_s28 }
 0x728   : > { %v1317_v56 = vpop.f32.mrb[18].mxu1  ;;  %p2677_p0 = scmp.lt.s32.totalorder %s3507_s7, %s2675_s28 }
 0x729   : > { %v2327_v57 = vpop.f32.mrb[19].mxu1 }
 0x72e   : > { %v1410_v58 = vpop.f32.mrb[20].mxu1 }
 0x72f   : > { %v2338_v59 = vpop.f32.mrb[21].mxu1  ;;  %v1416_v60 = vsel %vm1050_vm4, %v1410_v58, -inf }
 0x730   : > { %1417 = vmax.xlane.f32.xlu1 %v1416_v60  ;;  %v1413_v61 = vpop.f32.mrb[22].mxu1 }
 0x731   : > { %v2339_v62 = vpop.f32.mrb[23].mxu1 }
 0x741   : > { %1528 = vrot.lane.b32.xlu1 %v3364_v53, %s2816_s1 }
 0x745   : > { %1526 = vrot.lane.b32.xlu1 %v3356_v44, %s2816_s1 }
 0x7bd   : > { %v1418_v63 = vpop.xlane.xlu1 %1417 }
 0x7be   : > { %v1419_v0 = vsub.f32 %v1410_v58, %v1418_v63 }
 0x7c0   : > { %v1420_v2 = vmul.f32 1.442695, %v1419_v0  ;;  %v2520_v0 = vld [vmem:[%s3674_s0] sm:$0xff]   ;;  %s2676_s0 = scalar_lea.vmem %s2675_s28, 256 }
 0x7c1   : > { %v1529_v8 = vpop.permute.xlu1 %1528  ;;  %p2678_p8 = scmp.lt.s32.totalorder %s2676_s0, %s2670_s12 }
 0x7c2   : > { %2538 = vpow2.f32 %v1420_v2  ;;  %v1534_v10 = vsel %vm1050_vm4, %v1529_v8, 0 }
 0x7c3   : > { %p2679_p10 = por %p2678_p8, %p2677_p0 }
 0x7c5   : > { %v1527_v11 = vpop.permute.xlu1 %1526  ;;  %p2680_p7 = pnand %p2679_p10, %p2673_p12 }
 0x7cc   : > { %v2539_v3 = vpop.eup %2538 }
 0x7cd   : > { %v1422_v4 = vsel %vm1050_vm4, %v2539_v3, 0.0 }
 0x7ce   : > { %1423 = vadd.xlane.f32.xlu0 %v1422_v4 }
 0x7e4   : > { %1428 = vrot.lane.b32.xlu0 %v3358_v47, %s2815_s4 }
 0x85b   : > { %v1424_v5 = vpop.xlane.xlu0 %1423 }
 0x85c   : > { %2540 = vrcp.f32 %v1424_v5 }
 0x85f   : > { %v1429_v6 = vpop.permute.xlu0 %1428 }
 0x860   : > { %v1434_v53 = vsel %vm1112_vm3, %v1429_v6, 0  ;;  %v2211_v6 = vld [vmem:[%s799_s14] ss:$0 sm:$0xff] }
 0x861   : > { %2341 = vmatpush3.bf16.msra.mxu0 %v1434_v53 }
 0x862   : > { %2352 = vmatprep.subr.bf16.mxu0 %v2812_v17 }
 0x866   : > { %v2541_v44 = vpop.eup %2540 }
 0x867   : > { %v1426_v7 = vmul.f32 %v2541_v44, %v2539_v3  ;;  %v2212_v44 = vld [vmem:[%s802_s29] ss:$0 sm:$0xff] }
 0x869   : > { %v1427_v9 = vpack.c.bf16 %v1426_v7, %v1426_v7 }
 0x86b   : > { %2343 = vmatmul.mubr.msk.bf16.vlgmr.msra.gmra.mrb[16].mxu0 %vm1050_vm4, %v1427_v9 }
 0x86c   : > { %2353 = vmatpush3.bf16.xpose.msra.mxu0 %v1534_v10  ;;  %2354 = vmatprep.mubr.msk.bf16.mxu0 %vm2813_vm2, %v2812_v17  ;;  %v2522_v10 = vld [vmem:[%s3303_s6] sm:$0xff]  }
 0x86d   : > { %2364 = vmatprep.subr.bf16.mxu0 %v2812_v17 }
 0x873   : > { %2355 = vmatmul.mubr.msk.bf16.vlgmr.msra.gmra.mrb[20].mxu0 %vm1050_vm4, %v1527_v11  ;;  %v2523_v11 = vld [vmem:[%s3303_s6 + $0x8] sm:$0xff]   ;;  %s3680_s6 = sld [smem:[#allocation32_spill]] }
 0x874   : > { %2366 = vmatprep.mubr.msk.bf16.mxu0 %vm2813_vm2, %v2812_v17  ;;  %2365 = vmatpush3.bf16.msra.mxu0 %v1643_v33 }
 0x875   : > { %2378 = vmatprep.subr.bf16.mxu0 %v2812_v17 }
 0x93e   : > { %v1470_v14 = vpop.f32.mrb[16].mxu0 }
 0x93f   : > { %v1476_v15 = vpack.c.bf16 %v1470_v14, %v1470_v14  ;;  %v2344_v16 = vpop.f32.mrb[17].mxu0  ;;  %v2213_v14 = vld [vmem:[%s805_s20] ss:$0 sm:$0xff] }
 0x940   : > { %v1473_v18 = vpop.f32.mrb[18].mxu0 }
 0x941   : > { %v2345_v19 = vpop.f32.mrb[19].mxu0  ;;  %2349 = vmatmul.mubr.msk.bf16.vlgmr.msra.gmra.mrb[24].mxu1 %vm1050_vm4, %v1476_v15 }
 0x942   : > { %2360 = vmatprep.mubr.msk.bf16.mxu1 %vm2813_vm2, %v2812_v17 }
 0x946   : > { %v1570_v20 = vpop.f32.mrb[20].mxu0 }
 0x947   : > { %v2356_v21 = vpop.f32.mrb[21].mxu0  ;;  %v1576_v22 = vsel %vm1050_vm4, %v1570_v20, -inf }
 0x948   : > { %1577 = vmax.xlane.f32.xlu0 %v1576_v22  ;;  %v1573_v23 = vpop.f32.mrb[22].mxu0 }
 0x949   : > { %v2357_v24 = vpop.f32.mrb[23].mxu0 }
 0x95e   : > { %1588 = vrot.lane.b32.xlu0 %v3358_v47, %s2816_s1 }
 0x9d5   : > { %v1578_v25 = vpop.xlane.xlu0 %1577 }
 0x9d6   : > { %v1579_v26 = vsub.f32 %v1570_v20, %v1578_v25 }
 0x9d8   : > { %v1580_v27 = vmul.f32 1.442695, %v1579_v26  ;;  %v2217_v26 = vld [vmem:[%s813_s21] ss:$0 sm:$0xff]  ;;  %s1884_s21 = scalar_lea.sflag [#allocation5], %s3680_s6 }
 0x9d9   : > { %v1589_v28 = vpop.permute.xlu0 %1588 }
 0x9da   : > { %2542 = vpow2.f32 %v1580_v27  ;;  %v1594_v29 = vsel %vm1112_vm3, %v1589_v28, 0 }
 0x9db   : > { %2359 = vmatpush3.bf16.msra.mxu1 %v1594_v29 }
 0x9dc   : > { %2370 = vmatprep.subr.bf16.mxu1 %v2812_v17 }
 0x9e4   : > { %v2543_v30 = vpop.eup %2542 }
 0x9e5   : > { %v1582_v31 = vsel %vm1050_vm4, %v2543_v30, 0.0 }
 0x9e6   : > { %1583 = vadd.xlane.f32.xlu1 %v1582_v31 }
 0xa14   : > { %v1519_v47 = vpop.f32.mrb[24].mxu1 }
 0xa15   : > { %v1525_v34 = vadd.f32 %v1519_v47, %v3416_v54  ;;  %v2350_v35 = vpop.f32.mrb[25].mxu1 }
 0xa16   : > { %v1522_v36 = vpop.f32.mrb[26].mxu1 }
 0xa17   : > { %v2351_v37 = vpop.f32.mrb[27].mxu1 }
 0xa73   : > { %v1584_v38 = vpop.xlane.xlu1 %1583 }
 0xa74   : > { %2544 = vrcp.f32 %v1584_v38 }
 0xa7e   : > { %v2545_v39 = vpop.eup %2544 }
 0xa7f   : > { %v1586_v40 = vmul.f32 %v2545_v39, %v2543_v30 }
 0xa81   : > { %v1587_v41 = vpack.c.bf16 %v1586_v40, %v1586_v40 }
 0xa83   : > { %2361 = vmatmul.mubr.msk.bf16.vlgmr.msra.gmra.mrb[28].mxu1 %vm1050_vm4, %v1587_v41 }
 0xa84   : > { %2374 = vmatprep.mubr.msk.bf16.mxu1 %vm2813_vm2, %v2812_v17  ;;  %2371 = vmatpush3.bf16.msra.mxu1 %v2520_v0 }
 0xa85   : > { %2372 = vmatprep.subr.bf16.mxu1 %v2812_v17 }
 0xb56   : > { %v1630_v42 = vpop.f32.mrb[28].mxu1 }
 0xb57   : > { %v1636_v43 = vpack.c.bf16 %v1630_v42, %v1630_v42  ;;  %v2362_v45 = vpop.f32.mrb[29].mxu1 }
 0xb58   : > { %v1633_v46 = vpop.f32.mrb[30].mxu1 }
 0xb59   : > { %v2363_v48 = vpop.f32.mrb[31].mxu1  ;;  %2367 = vmatmul.mubr.msk.bf16.vlgmr.msra.gmra.mrb[24].mxu0 %vm1050_vm4, %v1636_v43 }
 0xb5a   : > { %2386 = vmatprep.mubr.msk.bf16.mxu0 %vm2813_vm2, %v2812_v17  ;;  %2379 = vmatpush3.bf16.msra.mxu0 %v2522_v10 }
 0xb5b   : > { %2380 = vmatprep.subr.bf16.mxu0 %v2812_v17 }
 0xb5e   : > { %2381 = vmatpush3.bf16.msra.mxu0 %v2523_v11 }
 0xb5f   : > { %2382 = vmatprep.subr.bf16.mxu0 %v2812_v17 }
 0xb62   : > { %2383 = vmatpush3.bf16.msra.mxu0 %v2524_v12 }
 0xb63   : > { %2384 = vmatprep.subr.bf16.mxu0 %v2812_v17 }
 0xb66   : > { %2385 = vmatpush3.bf16.msra.mxu0 %v2525_v13 }
 0xc2c   : > { %v1679_v49 = vpop.f32.mrb[24].mxu0 }
 0xc2d   : > { %v1685_v50 = vadd.f32 %v1679_v49, %v1525_v34  ;;  %v2368_v51 = vpop.f32.mrb[25].mxu0 }
 0xc2e   : > { %v1682_v54 = vpop.f32.mrb[26].mxu0 }
 0xc2f   : > { %v1686_v55 = vadd.f32 %v1685_v50, %v3309_v1  ;;  %v2369_v56 = vpop.f32.mrb[27].mxu0  ;;  %v2521_v1 = vld [vmem:[%s3675_s18 + $0x8] sm:$0xff]  }
 0xc30   : > { %2373 = vmatpush3.bf16.msra.mxu1 %v2521_v1 }
 0xc31   : > { %v1694_v57 = vadd.f32 %v2210_v52, %v1686_v55 }
 0xc33   : > { %v1697_v58 = vsel %vm826_vm1, %v1694_v57, 0.0 }
 0xc34   : > { %1698 = vadd.xlane.f32.xlu1 %v1697_v58 }
 0xcc1   : > { %v1699_v59 = vpop.xlane.xlu1 %1698 }
 0xcc2   : > { %v1700_v60 = vmul.f32 0.03125, %v1699_v59 }
 0xcc4   : > { %v1701_v61 = vsub.f32 %v1694_v57, %v1700_v60 }
 0xcc6   : > { %v1702_v62 = vmul.f32 %v1701_v61, %v1701_v61 }
 0xcc8   : > { %v1703_v63 = vsel %vm826_vm1, %v1702_v62, 0.0 }
 0xcc9   : > { %1704 = vadd.xlane.f32.xlu1 %v1703_v63 }
 0xd56   : > { %v1705_v2 = vpop.xlane.xlu1 %1704 }
 0xd57   : > { %v1706_v3 = vmul.f32 0.03125, %v1705_v2 }
 0xd59   : > { %v1707_v4 = vadd.f32 1e-05, %v1706_v3 }
 0xd5b   : > { %2546 = vrsqrt.f32 %v1707_v4 }
 0xd65   : > { %v2547_v5 = vpop.eup %2546 }
 0xd66   : > { %v1709_v53 = vmul.f32 %v2547_v5, %v1701_v61 }
 0xd68   : > { %v1716_v7 = vmul.f32 %v2211_v6, %v1709_v53 }
 0xd6a   : > { %v1723_v8 = vadd.f32 %v2212_v44, %v1716_v7 }
 0xd6c   : > { %v1724_v9 = vpack.c.bf16 %v1723_v8, %v1723_v8 }
 0xd6e   : > { %2375 = vmatmul.mubr.msk.bf16.vlgmr.msra.gmra.mrb[32].mxu1 %vm826_vm1, %v1724_v9 }
 0xe41   : > { %v1785_v15 = vpop.f32.mrb[32].mxu1 }
 0xe42   : > { %v1786_v16 = vadd.f32 %v2213_v14, %v1785_v15  ;;  %v2376_v18 = vpop.f32.mrb[33].mxu1 }
 0xe43   : > { %v1788_v19 = vpop.f32.mrb[34].mxu1 }
 0xe44   : > { %v1792_v20 = vmul.f32 0.70710677, %v1786_v16  ;;  %v2377_v21 = vpop.f32.mrb[35].mxu1  ;;  %v1791_v23 = vmul.f32 0.5, %v1786_v16 }
 0xe46   : > { %2548 = verf.f32 %v1792_v20 }
 0xe50   : > { %v2549_v22 = vpop.eup %2548 }
 0xe51   : > { %v1794_v17 = vadd.f32 1.0, %v2549_v22 }
 0xe53   : > { %v1795_v24 = vmul.f32 %v1794_v17, %v1791_v23 }
 0xe55   : > { %v1796_v25 = vpack.c.bf16 %v1795_v24, %v1795_v24 }
 0xe57   : > { %2387 = vmatmul.mubr.msk.bf16.vlgmr.msra.gmra.mrb[28].mxu0 %vm1836_vm5, %v1796_v25 }
 0xf2a   : > { %v1874_v27 = vpop.f32.mrb[28].mxu0 }
 0xf2b   : > { %v1875_v28 = vadd.f32 %v2217_v26, %v1874_v27  ;;  %v2388_v29 = vpop.f32.mrb[29].mxu0 }
 0xf2c   : > { %v1877_v30 = vpop.f32.mrb[30].mxu0 }
 0xf2d   : > { %v1880_v31 = vadd.f32 %v1875_v28, %v1694_v57  ;;  %v2389_v32 = vpop.f32.mrb[31].mxu0 }
 0xf2f   : > { %1881 = vst.msk [vmem:[#allocation2] sm:$0xff] %vm826_vm1, %v1880_v31  ;;  %1882 = vst.msk [vmem:[%s772_s25] sm:$0xff] %vm826_vm1, %v1880_v31 }
 0xf30   : > { %2683 = shalt.err (!%p2680_p7)
}
 0xf31   : > { %s2684_s5 = scalar_lea.hbm %s3505_s17, 128  ;;  %s2688_s11 = scalar_lea.hbm %s3683_s30, 256 }
 0xf32   : > { %p2685_p13 = scmp.ne.s32.totalorder %s3505_s17, %s2684_s5  ;;  %p2689_p1 = scmp.lt.u32.totalorder %s3505_s17, %s3683_s30 }
 0xf33   : > { %p2690_p3 = scmp.lt.u32.totalorder %s2688_s11, %s2684_s5  ;;  %p2692_p4 = scmp.lt.u32.totalorder %s2684_s5, %s3505_s17 }
 0xf34   : > { %p2686_p6 = pnand %p2685_p13, %p3684_p2 }
 0xf35   : > { %p2691_p9 = por %p2690_p3, %p2689_p1 }
 0xf36   : > { %p2687_p11 = pneg %p2686_p6 }
 0xf37   : > { %p2693_p5 = por %p2692_p4, %p2691_p9 }
 0xf39   : > { %p2694_p12 = pnand %p2693_p5, %p2687_p11 }
 0xf3b   : > { %2697 = shalt.err (!%p2694_p12)
}
 0xf3c   : > { %2398 = dma.vmem_to_hbm [thread:$0]  (%p3684_p2), %s3507_s7, 128, %s3505_s17, %s1884_s21  }
 0xf3d PF: > { %s3685_s15 = sld [smem:[#allocation25_spill]]  ;;  %s3686_s23 = sld [smem:[#allocation19_spill]] }
 0xf3e   : > { %s3687_s19 = sld [smem:[#allocation31_spill]] }
 0xf43   : > { %p2418_p0 = scmp.ge.s32.totalorder %s3685_s15, 2  ;;  %s1909_s14 = sand.u32 1, %s3686_s23  }
 0xf44   : > { %p3688_p8 = scmp.ne.s32.totalorder %s3687_s19, 0  ;;  %s1910_s29 = scalar_lea.sflag [#allocation5], %s1909_s14 }
 0xf46   : > { %p2414_p10 = pnand %p2418_p0, %p3688_p8 }
 0xf48   : > { %2759 = dma.done.wait (!%p2414_p10), %s1910_s29, 128  }
 0xf49   : > { %2761 = vsyncadd (!%p2414_p10), %s1910_s29, 4294967168  ;;  %s37_s28 = sadd.s32 1, %s3685_s15   ;;  %s3689_s18 = sld [smem:[#allocation17_spill]] }
 0xf4a   : > { %p34_p7 = scmp.ge.s32.totalorder %s37_s28, 6   ;;  %s3690_s19 = sld [smem:[#allocation18_spill]] }
 0xf4b   : > { %s3691_s20 = sld [smem:[#allocation28_spill]]  ;;  %s3692_s21 = sld [smem:[#allocation20_spill]] }
 0xf4c   : > { %s3693_s22 = sld [smem:[#allocation21_spill]]  ;;  %s3694_s23 = sld [smem:[#allocation29_spill]] }
 0xf4d   : > { %s3695_s24 = sld [smem:[#allocation23_spill]]  ;;  %s3696_s25 = sld [smem:[#allocation24_spill]] }
 0xf4e   : > { %s3697_s26 = sld [smem:[#allocation26_spill]]  ;;  %s3698_s27 = sld [smem:[#allocation27_spill]] }
 0xf4f   :  { %36 = sbr.rel (!%p34_p7) target bundleno = 28 (0x1c), region = 202 }
 0xf56   :  { %1915 = vsyncpa [#allocation4], 1 }
 0xf57   :  { %1917 = vsyncpa [#allocation4 + $0x1], 1 }
 0xf58   :  { %1918 = vsyncpa [#allocation7], 1 }
 0xf59   :  { %1920 = vsyncpa [#allocation7 + $0x1], 1 }
 0xf5a   :  { %1921 = vsyncpa [#allocation10], 1 }
 0xf5b   :  { %1923 = vsyncpa [#allocation10 + $0x1], 1 }
 0xf5c   :  { %1924 = vsyncpa [#allocation5], 1 }
 0xf5d   :  { %1926 = vsyncpa [#allocation5 + $0x1], 1 }

</bundles_post_ra>
